<compile_context>
chip_gen: v7x
topology: tpu7x:2x2x1
jax: 0.10.0
libtpu: 0.0.40
codegen_flags: <defaults>
</compile_context>

<pallas_src>
import functools

import jax
import jax.numpy as jnp
from jax.experimental import pallas as pl
from jax.experimental.pallas import tpu as pltpu


# ---------------------------------------------------------------------------
# Fused kernel
# ---------------------------------------------------------------------------
def fused_encoder_kernel(x_ref, wp_ref, bp_pos_ref,
                         wqkv_ref, bqkv_ref, wo_ref, bo_ref,
                         g1_ref, be1_ref, w1_ref, b1_ref, w2_ref, b2_ref,
                         g2_ref, be2_ref,
                         out_ref, tok_scratch,
                         *, B, T, D, num_heads, num_layers,
                         mm_dtype=jnp.bfloat16, eps=1e-5):
    f32 = jnp.float32
    hd = D // num_heads
    scale = 1.0 / float(hd) ** 0.5

    # ---- token projection: x @ Wp + (bias + positional)  -> [B, T*D] --------
    tf = (jnp.dot(x_ref[...].astype(mm_dtype), wp_ref[...],
                  preferred_element_type=f32)
          + bp_pos_ref[...])

    # [B, T*D] -> [B, T, D] relayout via static lane slices, staged through a
    # VMEM scratch (not the output ref).
    for t in range(T):
        tok_scratch[:, t, :] = tf[:, t * D:(t + 1) * D]
    # [B, T, D] -> [B*T, D]: leading-dim merge (T == f32 sublane tile -> no-op).
    cur = tok_scratch[...].reshape(B * T, D)

    # ---- encoder layers (static unrolled loop) ------------------------------
    for l in range(num_layers):
        # ----- fused QKV projection: one [B*T, D] @ [D, 3D] GEMM --------------
        qkv = (jnp.dot(cur.astype(mm_dtype), wqkv_ref[l],
                       preferred_element_type=f32)
               + bqkv_ref[l])                                    # [B*T, 3D] f32
        # 1/sqrt(hd) folded into q once (not per-head on the score tensor).
        q3 = (qkv[:, 0 * D:1 * D] * scale).reshape(B, T, D)
        k3 = qkv[:, 1 * D:2 * D].reshape(B, T, D)
        v3 = qkv[:, 2 * D:3 * D].reshape(B, T, D)

        # ----- multi-head attention (short static head loop, f32) ------------
        head_outs = []
        for h in range(num_heads):
            sl = slice(h * hd, (h + 1) * hd)
            s = jnp.einsum('bqd,bkd->bqk', q3[:, :, sl], k3[:, :, sl],
                           preferred_element_type=f32)           # [B, T, T]
            m = jnp.max(s, axis=-1, keepdims=True)
            e = jnp.exp(s - m)
            p = e / jnp.sum(e, axis=-1, keepdims=True)           # exact division
            head_outs.append(jnp.einsum('bqk,bkd->bqd', p, v3[:, :, sl],
                                        preferred_element_type=f32))
        # Concat heads on the lane axis, then ONE full-width output projection.
        attn_o = jnp.concatenate(head_outs, axis=-1).reshape(B * T, D)
        attn = (jnp.dot(attn_o.astype(mm_dtype), wo_ref[l],
                        preferred_element_type=f32)
                + bo_ref[l])
        # TODO(synk): dropout is train-only / stochastic -> identity (eval mode).

        # ----- residual + LayerNorm 1 (f32) -----------------------------------
        x1 = cur + attn
        mu = jnp.mean(x1, axis=-1, keepdims=True)
        var = jnp.mean((x1 - mu) ** 2, axis=-1, keepdims=True)
        x1 = (x1 - mu) * jax.lax.rsqrt(var + eps) * g1_ref[l] + be1_ref[l]

        # ----- feed-forward (relu), bf16 GEMMs with f32 accumulation ----------
        h1 = (jnp.dot(x1.astype(mm_dtype), w1_ref[l],
                      preferred_element_type=f32) + b1_ref[l])
        h1 = jnp.maximum(h1, 0.0)
        h2 = (jnp.dot(h1.astype(mm_dtype), w2_ref[l],
                      preferred_element_type=f32) + b2_ref[l])

        # ----- residual + LayerNorm 2 (f32) -----------------------------------
        x2 = x1 + h2
        mu2 = jnp.mean(x2, axis=-1, keepdims=True)
        var2 = jnp.mean((x2 - mu2) ** 2, axis=-1, keepdims=True)
        cur = (x2 - mu2) * jax.lax.rsqrt(var2 + eps) * g2_ref[l] + be2_ref[l]

    # [B*T, D] -> lane-dense [B, T*D]: lane-axis concat of token slabs, then a
    # single unmasked store to the (lane width 256) output buffer.
    cur3 = cur.reshape(B, T, D)
    out_ref[...] = jnp.concatenate([cur3[:, t, :] for t in range(T)], axis=-1)


# ---------------------------------------------------------------------------
# One-time parameter packing (stacking / QKV fusion / bf16 cast for matmul
# weights).  Done OUTSIDE the jitted per-call path.
# ---------------------------------------------------------------------------
_ARG_ORDER = ("wp", "bp_pos", "wqkv", "bqkv", "wo", "bo",
              "g1", "be1", "w1", "b1", "w2", "b2", "g2", "be2")


def prepare_params(raw, matmul_dtype=jnp.bfloat16):
    cd = matmul_dtype
    layers = raw["layers"]

    def stack(fn):
        return jnp.stack([fn(lp) for lp in layers], axis=0)

    return {
        "wp": raw["wp"].astype(cd),
        # token-proj bias + positional encoding pre-summed (one f32 row).
        "bp_pos": (raw["bp"] + raw["pos"].reshape(-1))[None, :].astype(jnp.float32),
        "wqkv": stack(lambda lp: jnp.concatenate(
            [lp["wq"], lp["wk"], lp["wv"]], axis=1)).astype(cd),
        "bqkv": stack(lambda lp: jnp.concatenate(
            [lp["bq"], lp["bk"], lp["bv"]], axis=0)[None, :]).astype(jnp.float32),
        "wo": stack(lambda lp: lp["wo"]).astype(cd),
        "bo": stack(lambda lp: lp["bo"][None, :]).astype(jnp.float32),
        "g1": stack(lambda lp: lp["g1"][None, :]).astype(jnp.float32),
        "be1": stack(lambda lp: lp["be1"][None, :]).astype(jnp.float32),
        "w1": stack(lambda lp: lp["w1"]).astype(cd),
        "b1": stack(lambda lp: lp["b1"][None, :]).astype(jnp.float32),
        "w2": stack(lambda lp: lp["w2"]).astype(cd),
        "b2": stack(lambda lp: lp["b2"][None, :]).astype(jnp.float32),
        "g2": stack(lambda lp: lp["g2"][None, :]).astype(jnp.float32),
        "be2": stack(lambda lp: lp["be2"][None, :]).astype(jnp.float32),
    }


# ---------------------------------------------------------------------------
# Jitted forward wrapper (single fused pallas_call, no grid)
# ---------------------------------------------------------------------------
@functools.partial(jax.jit, static_argnames=("num_tokens", "model_dim", "num_heads"))
def transformer_encoder_forward(x, packed, *, num_tokens, model_dim, num_heads):
    B = x.shape[0]
    T, D = num_tokens, model_dim
    NL = packed["wqkv"].shape[0]
    mm_dtype = packed["wqkv"].dtype

    args = [x] + [packed[k] for k in _ARG_ORDER]

    # Size scoped VMEM to the actual footprint (inputs + double-buffered output
    # + scratch) with headroom; clamp to stay safe on v7x's 64 MiB VMEM.
    footprint = sum(int(a.size) * a.dtype.itemsize for a in args)
    footprint += 2 * B * T * D * 4 + B * T * D * 4
    vmem_limit = int(min(max(2 * footprint + (8 << 20), 32 << 20), 48 << 20))

    kernel = functools.partial(
        fused_encoder_kernel, B=B, T=T, D=D,
        num_heads=num_heads, num_layers=NL, mm_dtype=mm_dtype)

    out_flat = pl.pallas_call(
        kernel,
        out_shape=jax.ShapeDtypeStruct((B, T * D), jnp.float32),   # lane-dense
        scratch_shapes=[pltpu.VMEM((B, T, D), jnp.float32)],
        compiler_params=pltpu.CompilerParams(vmem_limit_bytes=vmem_limit),
    )(*args)
    return out_flat.reshape(B, T, D)


# ---------------------------------------------------------------------------
# Pure-JAX (f32) reference, built directly from the raw (unpacked) parameters.
# ---------------------------------------------------------------------------
def _layer_norm(x, g, b, eps=1e-5):
    mu = jnp.mean(x, axis=-1, keepdims=True)
    var = jnp.mean((x - mu) ** 2, axis=-1, keepdims=True)
    return (x - mu) * jax.lax.rsqrt(var + eps) * g + b


def reference_forward(x, raw, *, num_tokens, model_dim, num_heads):
    B = x.shape[0]
    T, D = num_tokens, model_dim
    hd = D // num_heads
    tok = x @ raw["wp"] + raw["bp"]
    h = tok.reshape(B, T, D) + raw["pos"][None]
    for lp in raw["layers"]:
        q = h @ lp["wq"] + lp["bq"]
        k = h @ lp["wk"] + lp["bk"]
        v = h @ lp["wv"] + lp["bv"]
        qh = q.reshape(B, T, num_heads, hd).transpose(0, 2, 1, 3)
        kh = k.reshape(B, T, num_heads, hd).transpose(0, 2, 1, 3)
        vh = v.reshape(B, T, num_heads, hd).transpose(0, 2, 1, 3)
        s = jnp.einsum('bhqd,bhkd->bhqk', qh, kh) / jnp.sqrt(float(hd))
        p = jax.nn.softmax(s, axis=-1)
        o = jnp.einsum('bhqk,bhkd->bhqd', p, vh).transpose(0, 2, 1, 3).reshape(B, T, D)
        attn = o @ lp["wo"] + lp["bo"]
        x1 = _layer_norm(h + attn, lp["g1"], lp["be1"])
        ff = jnp.maximum(x1 @ lp["w1"] + lp["b1"], 0.0) @ lp["w2"] + lp["b2"]
        h = _layer_norm(x1 + ff, lp["g2"], lp["be2"])
    return h


# ---------------------------------------------------------------------------
# Deterministic parameter init + demo
# ---------------------------------------------------------------------------
if __name__ == "__main__":
    B = 2
    latent_dim = 32
    model_dim = 32
    num_tokens = 8
    num_layers = 2
    num_heads = 4
    dim_feedforward = 64

    D, F, T = model_dim, dim_feedforward, num_tokens

    key = jax.random.PRNGKey(0)
    keys = iter(jax.random.split(key, 256))

    def init(shape, scale):
        return jax.random.normal(next(keys), shape, dtype=jnp.float32) * scale

    raw = {
        "wp": init((latent_dim, D * T), latent_dim ** -0.5),
        "bp": init((D * T,), 0.02),
        # positional encoding ~ N(0,1), matching nn.Parameter(torch.randn(T, D))
        "pos": init((T, D), 1.0),
        "layers": [],
    }
    for _ in range(num_layers):
        raw["layers"].append(dict(
            wq=init((D, D), D ** -0.5), bq=init((D,), 0.02),
            wk=init((D, D), D ** -0.5), bk=init((D,), 0.02),
            wv=init((D, D), D ** -0.5), bv=init((D,), 0.02),
            wo=init((D, D), D ** -0.5), bo=init((D,), 0.02),
            g1=jnp.ones((D,), jnp.float32), be1=jnp.zeros((D,), jnp.float32),
            w1=init((D, F), D ** -0.5), b1=init((F,), 0.02),
            w2=init((F, D), F ** -0.5), b2=init((D,), 0.02),
            g2=jnp.ones((D,), jnp.float32), be2=jnp.zeros((D,), jnp.float32),
        ))

    x = jax.random.normal(next(keys), (B, latent_dim), dtype=jnp.float32)

    # Pack / fuse / bf16-cast the weights once (outside the per-call path).
    packed = prepare_params(raw, matmul_dtype=jnp.bfloat16)

    out = transformer_encoder_forward(
        x, packed, num_tokens=T, model_dim=D, num_heads=num_heads)
    out = jax.block_until_ready(out)

    assert out.shape == (B, T, D), out.shape
    assert bool(jnp.all(jnp.isfinite(out)))

    ref = jax.block_until_ready(reference_forward(
        x, raw, num_tokens=T, model_dim=D, num_heads=num_heads))
    max_err = float(jnp.max(jnp.abs(out - ref)))
    # Tolerance covers the bf16-operand / f32-accumulate MXU path vs the pure
    # f32 XLA reference (softmax/LayerNorm/residuals are exact f32 in-kernel).
    assert jnp.allclose(out, ref, rtol=5e-2, atol=5e-2), max_err

    print("KERNEL_OK")
</pallas_src>

<mosaic_0001>
module attributes {stable_mosaic.version = 11 : i64} {
  func.func @fused_encoder_kernel(%arg0: memref<2x32xf32, #tpu.memory_space<vmem>>, %arg1: memref<32x256xbf16, #tpu.memory_space<vmem>>, %arg2: memref<1x256xf32, #tpu.memory_space<vmem>>, %arg3: memref<2x32x96xbf16, #tpu.memory_space<vmem>>, %arg4: memref<2x1x96xf32, #tpu.memory_space<vmem>>, %arg5: memref<2x32x32xbf16, #tpu.memory_space<vmem>>, %arg6: memref<2x1x32xf32, #tpu.memory_space<vmem>>, %arg7: memref<2x1x32xf32, #tpu.memory_space<vmem>>, %arg8: memref<2x1x32xf32, #tpu.memory_space<vmem>>, %arg9: memref<2x32x64xbf16, #tpu.memory_space<vmem>>, %arg10: memref<2x1x64xf32, #tpu.memory_space<vmem>>, %arg11: memref<2x64x32xbf16, #tpu.memory_space<vmem>>, %arg12: memref<2x1x32xf32, #tpu.memory_space<vmem>>, %arg13: memref<2x1x32xf32, #tpu.memory_space<vmem>>, %arg14: memref<2x1x32xf32, #tpu.memory_space<vmem>>, %arg15: memref<2x256xf32, #tpu.memory_space<vmem>>, %arg16: memref<2x8x32xf32, #tpu.memory_space<vmem>>) attributes {dimension_semantics = [], scalar_prefetch = 0 : i64, scratch_operands = 1 : i64, tpu.core_type = #tpu.core_type<tc>} {
    %c0 = arith.constant 0 : index
    %c0_0 = arith.constant 0 : index
    %0 = vector.load %arg0[%c0, %c0_0] : memref<2x32xf32, #tpu.memory_space<vmem>>, vector<2x32xf32>
    %1 = arith.truncf %0 : vector<2x32xf32> to vector<2x32xbf16>
    %c0_1 = arith.constant 0 : index
    %c0_2 = arith.constant 0 : index
    %2 = vector.load %arg1[%c0_1, %c0_2] : memref<32x256xbf16, #tpu.memory_space<vmem>>, vector<32x256xbf16>
    %cst = arith.constant dense<0.000000e+00> : vector<2x256xf32>
    %3 = tpu.matmul %1, %2, %cst {dimension_numbers = #tpu.dot_dimension_numbers<[1], [0], [0], [1], [0, 0, 1, 1], [], []>} : vector<2x32xbf16>, vector<32x256xbf16>, vector<2x256xf32> -> vector<2x256xf32>
    %c0_3 = arith.constant 0 : index
    %c0_4 = arith.constant 0 : index
    %4 = vector.load %arg2[%c0_3, %c0_4] : memref<1x256xf32, #tpu.memory_space<vmem>>, vector<1x256xf32>
    %5 = vector.broadcast %4 : vector<1x256xf32> to vector<2x256xf32>
    %6 = arith.addf %3, %5 : vector<2x256xf32>
    %7 = vector.extract_strided_slice %6 {offsets = [0, 0], sizes = [2, 32], strides = [1, 1]} : vector<2x256xf32> to vector<2x32xf32>
    %c0_5 = arith.constant 0 : index
    %c0_6 = arith.constant 0 : index
    %c0_7 = arith.constant 0 : index
    %8 = vector.load %arg16[%c0_5, %c0_6, %c0_7] : memref<2x8x32xf32, #tpu.memory_space<vmem>>, vector<2x1x32xf32>
    %9 = vector.shape_cast %8 : vector<2x1x32xf32> to vector<2x32xf32>
    %10 = vector.shape_cast %7 : vector<2x32xf32> to vector<2x1x32xf32>
    tpu.vector_store %arg16[%c0_5, %c0_6, %c0_7], %10 {strides = array<i32>} : memref<2x8x32xf32, #tpu.memory_space<vmem>>, vector<2x1x32xf32>,
    %11 = vector.extract_strided_slice %6 {offsets = [0, 32], sizes = [2, 32], strides = [1, 1]} : vector<2x256xf32> to vector<2x32xf32>
    %c0_8 = arith.constant 0 : index
    %c1 = arith.constant 1 : index
    %c0_9 = arith.constant 0 : index
    %12 = vector.load %arg16[%c0_8, %c1, %c0_9] : memref<2x8x32xf32, #tpu.memory_space<vmem>>, vector<2x1x32xf32>
    %13 = vector.shape_cast %12 : vector<2x1x32xf32> to vector<2x32xf32>
    %14 = vector.shape_cast %11 : vector<2x32xf32> to vector<2x1x32xf32>
    tpu.vector_store %arg16[%c0_8, %c1, %c0_9], %14 {strides = array<i32>} : memref<2x8x32xf32, #tpu.memory_space<vmem>>, vector<2x1x32xf32>,
    %15 = vector.extract_strided_slice %6 {offsets = [0, 64], sizes = [2, 32], strides = [1, 1]} : vector<2x256xf32> to vector<2x32xf32>
    %c0_10 = arith.constant 0 : index
    %c2 = arith.constant 2 : index
    %c0_11 = arith.constant 0 : index
    %16 = vector.load %arg16[%c0_10, %c2, %c0_11] : memref<2x8x32xf32, #tpu.memory_space<vmem>>, vector<2x1x32xf32>
    %17 = vector.shape_cast %16 : vector<2x1x32xf32> to vector<2x32xf32>
    %18 = vector.shape_cast %15 : vector<2x32xf32> to vector<2x1x32xf32>
    tpu.vector_store %arg16[%c0_10, %c2, %c0_11], %18 {strides = array<i32>} : memref<2x8x32xf32, #tpu.memory_space<vmem>>, vector<2x1x32xf32>,
    %19 = vector.extract_strided_slice %6 {offsets = [0, 96], sizes = [2, 32], strides = [1, 1]} : vector<2x256xf32> to vector<2x32xf32>
    %c0_12 = arith.constant 0 : index
    %c3 = arith.constant 3 : index
    %c0_13 = arith.constant 0 : index
    %20 = vector.load %arg16[%c0_12, %c3, %c0_13] : memref<2x8x32xf32, #tpu.memory_space<vmem>>, vector<2x1x32xf32>
    %21 = vector.shape_cast %20 : vector<2x1x32xf32> to vector<2x32xf32>
    %22 = vector.shape_cast %19 : vector<2x32xf32> to vector<2x1x32xf32>
    tpu.vector_store %arg16[%c0_12, %c3, %c0_13], %22 {strides = array<i32>} : memref<2x8x32xf32, #tpu.memory_space<vmem>>, vector<2x1x32xf32>,
    %23 = vector.extract_strided_slice %6 {offsets = [0, 128], sizes = [2, 32], strides = [1, 1]} : vector<2x256xf32> to vector<2x32xf32>
    %c0_14 = arith.constant 0 : index
    %c4 = arith.constant 4 : index
    %c0_15 = arith.constant 0 : index
    %24 = vector.load %arg16[%c0_14, %c4, %c0_15] : memref<2x8x32xf32, #tpu.memory_space<vmem>>, vector<2x1x32xf32>
    %25 = vector.shape_cast %24 : vector<2x1x32xf32> to vector<2x32xf32>
    %26 = vector.shape_cast %23 : vector<2x32xf32> to vector<2x1x32xf32>
    tpu.vector_store %arg16[%c0_14, %c4, %c0_15], %26 {strides = array<i32>} : memref<2x8x32xf32, #tpu.memory_space<vmem>>, vector<2x1x32xf32>,
    %27 = vector.extract_strided_slice %6 {offsets = [0, 160], sizes = [2, 32], strides = [1, 1]} : vector<2x256xf32> to vector<2x32xf32>
    %c0_16 = arith.constant 0 : index
    %c5 = arith.constant 5 : index
    %c0_17 = arith.constant 0 : index
    %28 = vector.load %arg16[%c0_16, %c5, %c0_17] : memref<2x8x32xf32, #tpu.memory_space<vmem>>, vector<2x1x32xf32>
    %29 = vector.shape_cast %28 : vector<2x1x32xf32> to vector<2x32xf32>
    %30 = vector.shape_cast %27 : vector<2x32xf32> to vector<2x1x32xf32>
    tpu.vector_store %arg16[%c0_16, %c5, %c0_17], %30 {strides = array<i32>} : memref<2x8x32xf32, #tpu.memory_space<vmem>>, vector<2x1x32xf32>,
    %31 = vector.extract_strided_slice %6 {offsets = [0, 192], sizes = [2, 32], strides = [1, 1]} : vector<2x256xf32> to vector<2x32xf32>
    %c0_18 = arith.constant 0 : index
    %c6 = arith.constant 6 : index
    %c0_19 = arith.constant 0 : index
    %32 = vector.load %arg16[%c0_18, %c6, %c0_19] : memref<2x8x32xf32, #tpu.memory_space<vmem>>, vector<2x1x32xf32>
    %33 = vector.shape_cast %32 : vector<2x1x32xf32> to vector<2x32xf32>
    %34 = vector.shape_cast %31 : vector<2x32xf32> to vector<2x1x32xf32>
    tpu.vector_store %arg16[%c0_18, %c6, %c0_19], %34 {strides = array<i32>} : memref<2x8x32xf32, #tpu.memory_space<vmem>>, vector<2x1x32xf32>,
    %35 = vector.extract_strided_slice %6 {offsets = [0, 224], sizes = [2, 32], strides = [1, 1]} : vector<2x256xf32> to vector<2x32xf32>
    %c0_20 = arith.constant 0 : index
    %c7 = arith.constant 7 : index
    %c0_21 = arith.constant 0 : index
    %36 = vector.load %arg16[%c0_20, %c7, %c0_21] : memref<2x8x32xf32, #tpu.memory_space<vmem>>, vector<2x1x32xf32>
    %37 = vector.shape_cast %36 : vector<2x1x32xf32> to vector<2x32xf32>
    %38 = vector.shape_cast %35 : vector<2x32xf32> to vector<2x1x32xf32>
    tpu.vector_store %arg16[%c0_20, %c7, %c0_21], %38 {strides = array<i32>} : memref<2x8x32xf32, #tpu.memory_space<vmem>>, vector<2x1x32xf32>,
    %c0_22 = arith.constant 0 : index
    %c0_23 = arith.constant 0 : index
    %c0_24 = arith.constant 0 : index
    %39 = vector.load %arg16[%c0_22, %c0_23, %c0_24] : memref<2x8x32xf32, #tpu.memory_space<vmem>>, vector<2x8x32xf32>
    %40 = vector.shape_cast %39 : vector<2x8x32xf32> to vector<16x32xf32>
    %41 = arith.truncf %40 : vector<16x32xf32> to vector<16x32xbf16>
    %c0_25 = arith.constant 0 : index
    %c0_26 = arith.constant 0 : index
    %c0_27 = arith.constant 0 : index
    %42 = vector.load %arg3[%c0_25, %c0_26, %c0_27] : memref<2x32x96xbf16, #tpu.memory_space<vmem>>, vector<1x32x96xbf16>
    %43 = vector.shape_cast %42 : vector<1x32x96xbf16> to vector<32x96xbf16>
    %cst_28 = arith.constant dense<0.000000e+00> : vector<16x96xf32>
    %44 = tpu.matmul %41, %43, %cst_28 {dimension_numbers = #tpu.dot_dimension_numbers<[1], [0], [0], [1], [0, 0, 1, 1], [], []>} : vector<16x32xbf16>, vector<32x96xbf16>, vector<16x96xf32> -> vector<16x96xf32>
    %c0_29 = arith.constant 0 : index
    %c0_30 = arith.constant 0 : index
    %c0_31 = arith.constant 0 : index
    %45 = vector.load %arg4[%c0_29, %c0_30, %c0_31] : memref<2x1x96xf32, #tpu.memory_space<vmem>>, vector<1x1x96xf32>
    %46 = vector.shape_cast %45 : vector<1x1x96xf32> to vector<1x96xf32>
    %47 = vector.broadcast %46 : vector<1x96xf32> to vector<16x96xf32>
    %48 = arith.addf %44, %47 : vector<16x96xf32>
    %49 = vector.extract_strided_slice %48 {offsets = [0, 0], sizes = [16, 32], strides = [1, 1]} : vector<16x96xf32> to vector<16x32xf32>
    %cst_32 = arith.constant 0.353553385 : f32
    %50 = vector.broadcast %cst_32 : f32 to vector<16x32xf32>
    %51 = arith.mulf %49, %50 : vector<16x32xf32>
    %52 = vector.shape_cast %51 : vector<16x32xf32> to vector<2x8x32xf32>
    %53 = vector.extract_strided_slice %48 {offsets = [0, 32], sizes = [16, 32], strides = [1, 1]} : vector<16x96xf32> to vector<16x32xf32>
    %54 = vector.shape_cast %53 : vector<16x32xf32> to vector<2x8x32xf32>
    %55 = vector.extract_strided_slice %48 {offsets = [0, 64], sizes = [16, 32], strides = [1, 1]} : vector<16x96xf32> to vector<16x32xf32>
    %56 = vector.shape_cast %55 : vector<16x32xf32> to vector<2x8x32xf32>
    %57 = vector.extract_strided_slice %52 {offsets = [0, 0, 0], sizes = [2, 8, 8], strides = [1, 1, 1]} : vector<2x8x32xf32> to vector<2x8x8xf32>
    %58 = vector.extract_strided_slice %54 {offsets = [0, 0, 0], sizes = [2, 8, 8], strides = [1, 1, 1]} : vector<2x8x32xf32> to vector<2x8x8xf32>
    "tpu.trace_start"() <{level = 10 : i32, message = "bqd,bkd->bqk"}> : () -> ()
    %cst_33 = arith.constant dense<0.000000e+00> : vector<2x8x8xf32>
    %59 = tpu.matmul %57, %58, %cst_33 {dimension_numbers = #tpu.dot_dimension_numbers<[2], [2], [1], [1], [0, 0, 0, 1, 1, 1], [0], [0]>} : vector<2x8x8xf32>, vector<2x8x8xf32>, vector<2x8x8xf32> -> vector<2x8x8xf32>
    "tpu.trace_stop"() : () -> ()
    %cst_34 = arith.constant dense<0xFF800000> : vector<2x8xf32>
    %60 = vector.multi_reduction <maximumf>, %59, %cst_34 [2] : vector<2x8x8xf32> to vector<2x8xf32>
    %61 = vector.shape_cast %60 : vector<2x8xf32> to vector<2x8x1xf32>
    %62 = vector.broadcast %61 : vector<2x8x1xf32> to vector<2x8x8xf32>
    %63 = arith.subf %59, %62 : vector<2x8x8xf32>
    %64 = math.exp %63 : vector<2x8x8xf32>
    %cst_35 = arith.constant dense<0.000000e+00> : vector<2x8xf32>
    %65 = vector.multi_reduction <add>, %64, %cst_35 [2] : vector<2x8x8xf32> to vector<2x8xf32>
    %66 = vector.shape_cast %65 : vector<2x8xf32> to vector<2x8x1xf32>
    %67 = vector.broadcast %66 : vector<2x8x1xf32> to vector<2x8x8xf32>
    %68 = arith.divf %64, %67 : vector<2x8x8xf32>
    %69 = vector.extract_strided_slice %56 {offsets = [0, 0, 0], sizes = [2, 8, 8], strides = [1, 1, 1]} : vector<2x8x32xf32> to vector<2x8x8xf32>
    "tpu.trace_start"() <{level = 10 : i32, message = "bqk,bkd->bqd"}> : () -> ()
    %cst_36 = arith.constant dense<0.000000e+00> : vector<2x8x8xf32>
    %70 = tpu.matmul %68, %69, %cst_36 {dimension_numbers = #tpu.dot_dimension_numbers<[2], [1], [1], [2], [0, 0, 0, 1, 1, 2], [0], [0]>} : vector<2x8x8xf32>, vector<2x8x8xf32>, vector<2x8x8xf32> -> vector<2x8x8xf32>
    "tpu.trace_stop"() : () -> ()
    %71 = vector.extract_strided_slice %52 {offsets = [0, 0, 8], sizes = [2, 8, 8], strides = [1, 1, 1]} : vector<2x8x32xf32> to vector<2x8x8xf32>
    %72 = vector.extract_strided_slice %54 {offsets = [0, 0, 8], sizes = [2, 8, 8], strides = [1, 1, 1]} : vector<2x8x32xf32> to vector<2x8x8xf32>
    "tpu.trace_start"() <{level = 10 : i32, message = "bqd,bkd->bqk"}> : () -> ()
    %cst_37 = arith.constant dense<0.000000e+00> : vector<2x8x8xf32>
    %73 = tpu.matmul %71, %72, %cst_37 {dimension_numbers = #tpu.dot_dimension_numbers<[2], [2], [1], [1], [0, 0, 0, 1, 1, 1], [0], [0]>} : vector<2x8x8xf32>, vector<2x8x8xf32>, vector<2x8x8xf32> -> vector<2x8x8xf32>
    "tpu.trace_stop"() : () -> ()
    %cst_38 = arith.constant dense<0xFF800000> : vector<2x8xf32>
    %74 = vector.multi_reduction <maximumf>, %73, %cst_38 [2] : vector<2x8x8xf32> to vector<2x8xf32>
    %75 = vector.shape_cast %74 : vector<2x8xf32> to vector<2x8x1xf32>
    %76 = vector.broadcast %75 : vector<2x8x1xf32> to vector<2x8x8xf32>
    %77 = arith.subf %73, %76 : vector<2x8x8xf32>
    %78 = math.exp %77 : vector<2x8x8xf32>
    %cst_39 = arith.constant dense<0.000000e+00> : vector<2x8xf32>
    %79 = vector.multi_reduction <add>, %78, %cst_39 [2] : vector<2x8x8xf32> to vector<2x8xf32>
    %80 = vector.shape_cast %79 : vector<2x8xf32> to vector<2x8x1xf32>
    %81 = vector.broadcast %80 : vector<2x8x1xf32> to vector<2x8x8xf32>
    %82 = arith.divf %78, %81 : vector<2x8x8xf32>
    %83 = vector.extract_strided_slice %56 {offsets = [0, 0, 8], sizes = [2, 8, 8], strides = [1, 1, 1]} : vector<2x8x32xf32> to vector<2x8x8xf32>
    "tpu.trace_start"() <{level = 10 : i32, message = "bqk,bkd->bqd"}> : () -> ()
    %cst_40 = arith.constant dense<0.000000e+00> : vector<2x8x8xf32>
    %84 = tpu.matmul %82, %83, %cst_40 {dimension_numbers = #tpu.dot_dimension_numbers<[2], [1], [1], [2], [0, 0, 0, 1, 1, 2], [0], [0]>} : vector<2x8x8xf32>, vector<2x8x8xf32>, vector<2x8x8xf32> -> vector<2x8x8xf32>
    "tpu.trace_stop"() : () -> ()
    %85 = vector.extract_strided_slice %52 {offsets = [0, 0, 16], sizes = [2, 8, 8], strides = [1, 1, 1]} : vector<2x8x32xf32> to vector<2x8x8xf32>
    %86 = vector.extract_strided_slice %54 {offsets = [0, 0, 16], sizes = [2, 8, 8], strides = [1, 1, 1]} : vector<2x8x32xf32> to vector<2x8x8xf32>
    "tpu.trace_start"() <{level = 10 : i32, message = "bqd,bkd->bqk"}> : () -> ()
    %cst_41 = arith.constant dense<0.000000e+00> : vector<2x8x8xf32>
    %87 = tpu.matmul %85, %86, %cst_41 {dimension_numbers = #tpu.dot_dimension_numbers<[2], [2], [1], [1], [0, 0, 0, 1, 1, 1], [0], [0]>} : vector<2x8x8xf32>, vector<2x8x8xf32>, vector<2x8x8xf32> -> vector<2x8x8xf32>
    "tpu.trace_stop"() : () -> ()
    %cst_42 = arith.constant dense<0xFF800000> : vector<2x8xf32>
    %88 = vector.multi_reduction <maximumf>, %87, %cst_42 [2] : vector<2x8x8xf32> to vector<2x8xf32>
    %89 = vector.shape_cast %88 : vector<2x8xf32> to vector<2x8x1xf32>
    %90 = vector.broadcast %89 : vector<2x8x1xf32> to vector<2x8x8xf32>
    %91 = arith.subf %87, %90 : vector<2x8x8xf32>
    %92 = math.exp %91 : vector<2x8x8xf32>
    %cst_43 = arith.constant dense<0.000000e+00> : vector<2x8xf32>
    %93 = vector.multi_reduction <add>, %92, %cst_43 [2] : vector<2x8x8xf32> to vector<2x8xf32>
    %94 = vector.shape_cast %93 : vector<2x8xf32> to vector<2x8x1xf32>
    %95 = vector.broadcast %94 : vector<2x8x1xf32> to vector<2x8x8xf32>
    %96 = arith.divf %92, %95 : vector<2x8x8xf32>
    %97 = vector.extract_strided_slice %56 {offsets = [0, 0, 16], sizes = [2, 8, 8], strides = [1, 1, 1]} : vector<2x8x32xf32> to vector<2x8x8xf32>
    "tpu.trace_start"() <{level = 10 : i32, message = "bqk,bkd->bqd"}> : () -> ()
    %cst_44 = arith.constant dense<0.000000e+00> : vector<2x8x8xf32>
    %98 = tpu.matmul %96, %97, %cst_44 {dimension_numbers = #tpu.dot_dimension_numbers<[2], [1], [1], [2], [0, 0, 0, 1, 1, 2], [0], [0]>} : vector<2x8x8xf32>, vector<2x8x8xf32>, vector<2x8x8xf32> -> vector<2x8x8xf32>
    "tpu.trace_stop"() : () -> ()
    %99 = vector.extract_strided_slice %52 {offsets = [0, 0, 24], sizes = [2, 8, 8], strides = [1, 1, 1]} : vector<2x8x32xf32> to vector<2x8x8xf32>
    %100 = vector.extract_strided_slice %54 {offsets = [0, 0, 24], sizes = [2, 8, 8], strides = [1, 1, 1]} : vector<2x8x32xf32> to vector<2x8x8xf32>
    "tpu.trace_start"() <{level = 10 : i32, message = "bqd,bkd->bqk"}> : () -> ()
    %cst_45 = arith.constant dense<0.000000e+00> : vector<2x8x8xf32>
    %101 = tpu.matmul %99, %100, %cst_45 {dimension_numbers = #tpu.dot_dimension_numbers<[2], [2], [1], [1], [0, 0, 0, 1, 1, 1], [0], [0]>} : vector<2x8x8xf32>, vector<2x8x8xf32>, vector<2x8x8xf32> -> vector<2x8x8xf32>
    "tpu.trace_stop"() : () -> ()
    %cst_46 = arith.constant dense<0xFF800000> : vector<2x8xf32>
    %102 = vector.multi_reduction <maximumf>, %101, %cst_46 [2] : vector<2x8x8xf32> to vector<2x8xf32>
    %103 = vector.shape_cast %102 : vector<2x8xf32> to vector<2x8x1xf32>
    %104 = vector.broadcast %103 : vector<2x8x1xf32> to vector<2x8x8xf32>
    %105 = arith.subf %101, %104 : vector<2x8x8xf32>
    %106 = math.exp %105 : vector<2x8x8xf32>
    %cst_47 = arith.constant dense<0.000000e+00> : vector<2x8xf32>
    %107 = vector.multi_reduction <add>, %106, %cst_47 [2] : vector<2x8x8xf32> to vector<2x8xf32>
    %108 = vector.shape_cast %107 : vector<2x8xf32> to vector<2x8x1xf32>
    %109 = vector.broadcast %108 : vector<2x8x1xf32> to vector<2x8x8xf32>
    %110 = arith.divf %106, %109 : vector<2x8x8xf32>
    %111 = vector.extract_strided_slice %56 {offsets = [0, 0, 24], sizes = [2, 8, 8], strides = [1, 1, 1]} : vector<2x8x32xf32> to vector<2x8x8xf32>
    "tpu.trace_start"() <{level = 10 : i32, message = "bqk,bkd->bqd"}> : () -> ()
    %cst_48 = arith.constant dense<0.000000e+00> : vector<2x8x8xf32>
    %112 = tpu.matmul %110, %111, %cst_48 {dimension_numbers = #tpu.dot_dimension_numbers<[2], [1], [1], [2], [0, 0, 0, 1, 1, 2], [0], [0]>} : vector<2x8x8xf32>, vector<2x8x8xf32>, vector<2x8x8xf32> -> vector<2x8x8xf32>
    "tpu.trace_stop"() : () -> ()
    %113 = tpu.concatenate %70, %84, %98, %112 in 2 : vector<2x8x8xf32>, vector<2x8x8xf32>, vector<2x8x8xf32>, vector<2x8x8xf32> -> vector<2x8x32xf32>
    %114 = vector.shape_cast %113 : vector<2x8x32xf32> to vector<16x32xf32>
    %115 = arith.truncf %114 : vector<16x32xf32> to vector<16x32xbf16>
    %c0_49 = arith.constant 0 : index
    %c0_50 = arith.constant 0 : index
    %c0_51 = arith.constant 0 : index
    %116 = vector.load %arg5[%c0_49, %c0_50, %c0_51] : memref<2x32x32xbf16, #tpu.memory_space<vmem>>, vector<1x32x32xbf16>
    %117 = vector.shape_cast %116 : vector<1x32x32xbf16> to vector<32x32xbf16>
    %cst_52 = arith.constant dense<0.000000e+00> : vector<16x32xf32>
    %118 = tpu.matmul %115, %117, %cst_52 {dimension_numbers = #tpu.dot_dimension_numbers<[1], [0], [0], [1], [0, 0, 1, 1], [], []>} : vector<16x32xbf16>, vector<32x32xbf16>, vector<16x32xf32> -> vector<16x32xf32>
    %c0_53 = arith.constant 0 : index
    %c0_54 = arith.constant 0 : index
    %c0_55 = arith.constant 0 : index
    %119 = vector.load %arg6[%c0_53, %c0_54, %c0_55] : memref<2x1x32xf32, #tpu.memory_space<vmem>>, vector<1x1x32xf32>
    %120 = vector.shape_cast %119 : vector<1x1x32xf32> to vector<1x32xf32>
    %121 = vector.broadcast %120 : vector<1x32xf32> to vector<16x32xf32>
    %122 = arith.addf %118, %121 : vector<16x32xf32>
    %123 = arith.addf %40, %122 : vector<16x32xf32>
    %cst_56 = arith.constant dense<0.000000e+00> : vector<16xf32>
    %124 = vector.multi_reduction <add>, %123, %cst_56 [1] : vector<16x32xf32> to vector<16xf32>
    %125 = vector.shape_cast %124 : vector<16xf32> to vector<16x1xf32>
    %cst_57 = arith.constant 3.200000e+01 : f32
    %126 = vector.broadcast %cst_57 : f32 to vector<16x1xf32>
    %127 = arith.divf %125, %126 : vector<16x1xf32>
    %128 = vector.broadcast %127 : vector<16x1xf32> to vector<16x32xf32>
    %129 = arith.subf %123, %128 : vector<16x32xf32>
    %130 = arith.mulf %129, %129 : vector<16x32xf32>
    %cst_58 = arith.constant dense<0.000000e+00> : vector<16xf32>
    %131 = vector.multi_reduction <add>, %130, %cst_58 [1] : vector<16x32xf32> to vector<16xf32>
    %132 = vector.shape_cast %131 : vector<16xf32> to vector<16x1xf32>
    %cst_59 = arith.constant 3.200000e+01 : f32
    %133 = vector.broadcast %cst_59 : f32 to vector<16x1xf32>
    %134 = arith.divf %132, %133 : vector<16x1xf32>
    %135 = vector.broadcast %127 : vector<16x1xf32> to vector<16x32xf32>
    %136 = arith.subf %123, %135 : vector<16x32xf32>
    %cst_60 = arith.constant 9.99999974E-6 : f32
    %137 = vector.broadcast %cst_60 : f32 to vector<16x1xf32>
    %138 = arith.addf %134, %137 : vector<16x1xf32>
    %139 = math.rsqrt %138 : vector<16x1xf32>
    %140 = vector.broadcast %139 : vector<16x1xf32> to vector<16x32xf32>
    %141 = arith.mulf %136, %140 : vector<16x32xf32>
    %c0_61 = arith.constant 0 : index
    %c0_62 = arith.constant 0 : index
    %c0_63 = arith.constant 0 : index
    %142 = vector.load %arg7[%c0_61, %c0_62, %c0_63] : memref<2x1x32xf32, #tpu.memory_space<vmem>>, vector<1x1x32xf32>
    %143 = vector.shape_cast %142 : vector<1x1x32xf32> to vector<1x32xf32>
    %144 = vector.broadcast %143 : vector<1x32xf32> to vector<16x32xf32>
    %145 = arith.mulf %141, %144 : vector<16x32xf32>
    %c0_64 = arith.constant 0 : index
    %c0_65 = arith.constant 0 : index
    %c0_66 = arith.constant 0 : index
    %146 = vector.load %arg8[%c0_64, %c0_65, %c0_66] : memref<2x1x32xf32, #tpu.memory_space<vmem>>, vector<1x1x32xf32>
    %147 = vector.shape_cast %146 : vector<1x1x32xf32> to vector<1x32xf32>
    %148 = vector.broadcast %147 : vector<1x32xf32> to vector<16x32xf32>
    %149 = arith.addf %145, %148 : vector<16x32xf32>
    %150 = arith.truncf %149 : vector<16x32xf32> to vector<16x32xbf16>
    %c0_67 = arith.constant 0 : index
    %c0_68 = arith.constant 0 : index
    %c0_69 = arith.constant 0 : index
    %151 = vector.load %arg9[%c0_67, %c0_68, %c0_69] : memref<2x32x64xbf16, #tpu.memory_space<vmem>>, vector<1x32x64xbf16>
    %152 = vector.shape_cast %151 : vector<1x32x64xbf16> to vector<32x64xbf16>
    %cst_70 = arith.constant dense<0.000000e+00> : vector<16x64xf32>
    %153 = tpu.matmul %150, %152, %cst_70 {dimension_numbers = #tpu.dot_dimension_numbers<[1], [0], [0], [1], [0, 0, 1, 1], [], []>} : vector<16x32xbf16>, vector<32x64xbf16>, vector<16x64xf32> -> vector<16x64xf32>
    %c0_71 = arith.constant 0 : index
    %c0_72 = arith.constant 0 : index
    %c0_73 = arith.constant 0 : index
    %154 = vector.load %arg10[%c0_71, %c0_72, %c0_73] : memref<2x1x64xf32, #tpu.memory_space<vmem>>, vector<1x1x64xf32>
    %155 = vector.shape_cast %154 : vector<1x1x64xf32> to vector<1x64xf32>
    %156 = vector.broadcast %155 : vector<1x64xf32> to vector<16x64xf32>
    %157 = arith.addf %153, %156 : vector<16x64xf32>
    %cst_74 = arith.constant 0.000000e+00 : f32
    %158 = vector.broadcast %cst_74 : f32 to vector<16x64xf32>
    %159 = arith.maximumf %157, %158 : vector<16x64xf32>
    %160 = arith.truncf %159 : vector<16x64xf32> to vector<16x64xbf16>
    %c0_75 = arith.constant 0 : index
    %c0_76 = arith.constant 0 : index
    %c0_77 = arith.constant 0 : index
    %161 = vector.load %arg11[%c0_75, %c0_76, %c0_77] : memref<2x64x32xbf16, #tpu.memory_space<vmem>>, vector<1x64x32xbf16>
    %162 = vector.shape_cast %161 : vector<1x64x32xbf16> to vector<64x32xbf16>
    %cst_78 = arith.constant dense<0.000000e+00> : vector<16x32xf32>
    %163 = tpu.matmul %160, %162, %cst_78 {dimension_numbers = #tpu.dot_dimension_numbers<[1], [0], [0], [1], [0, 0, 1, 1], [], []>} : vector<16x64xbf16>, vector<64x32xbf16>, vector<16x32xf32> -> vector<16x32xf32>
    %c0_79 = arith.constant 0 : index
    %c0_80 = arith.constant 0 : index
    %c0_81 = arith.constant 0 : index
    %164 = vector.load %arg12[%c0_79, %c0_80, %c0_81] : memref<2x1x32xf32, #tpu.memory_space<vmem>>, vector<1x1x32xf32>
    %165 = vector.shape_cast %164 : vector<1x1x32xf32> to vector<1x32xf32>
    %166 = vector.broadcast %165 : vector<1x32xf32> to vector<16x32xf32>
    %167 = arith.addf %163, %166 : vector<16x32xf32>
    %168 = arith.addf %149, %167 : vector<16x32xf32>
    %cst_82 = arith.constant dense<0.000000e+00> : vector<16xf32>
    %169 = vector.multi_reduction <add>, %168, %cst_82 [1] : vector<16x32xf32> to vector<16xf32>
    %170 = vector.shape_cast %169 : vector<16xf32> to vector<16x1xf32>
    %cst_83 = arith.constant 3.200000e+01 : f32
    %171 = vector.broadcast %cst_83 : f32 to vector<16x1xf32>
    %172 = arith.divf %170, %171 : vector<16x1xf32>
    %173 = vector.broadcast %172 : vector<16x1xf32> to vector<16x32xf32>
    %174 = arith.subf %168, %173 : vector<16x32xf32>
    %175 = arith.mulf %174, %174 : vector<16x32xf32>
    %cst_84 = arith.constant dense<0.000000e+00> : vector<16xf32>
    %176 = vector.multi_reduction <add>, %175, %cst_84 [1] : vector<16x32xf32> to vector<16xf32>
    %177 = vector.shape_cast %176 : vector<16xf32> to vector<16x1xf32>
    %cst_85 = arith.constant 3.200000e+01 : f32
    %178 = vector.broadcast %cst_85 : f32 to vector<16x1xf32>
    %179 = arith.divf %177, %178 : vector<16x1xf32>
    %180 = vector.broadcast %172 : vector<16x1xf32> to vector<16x32xf32>
    %181 = arith.subf %168, %180 : vector<16x32xf32>
    %cst_86 = arith.constant 9.99999974E-6 : f32
    %182 = vector.broadcast %cst_86 : f32 to vector<16x1xf32>
    %183 = arith.addf %179, %182 : vector<16x1xf32>
    %184 = math.rsqrt %183 : vector<16x1xf32>
    %185 = vector.broadcast %184 : vector<16x1xf32> to vector<16x32xf32>
    %186 = arith.mulf %181, %185 : vector<16x32xf32>
    %c0_87 = arith.constant 0 : index
    %c0_88 = arith.constant 0 : index
    %c0_89 = arith.constant 0 : index
    %187 = vector.load %arg13[%c0_87, %c0_88, %c0_89] : memref<2x1x32xf32, #tpu.memory_space<vmem>>, vector<1x1x32xf32>
    %188 = vector.shape_cast %187 : vector<1x1x32xf32> to vector<1x32xf32>
    %189 = vector.broadcast %188 : vector<1x32xf32> to vector<16x32xf32>
    %190 = arith.mulf %186, %189 : vector<16x32xf32>
    %c0_90 = arith.constant 0 : index
    %c0_91 = arith.constant 0 : index
    %c0_92 = arith.constant 0 : index
    %191 = vector.load %arg14[%c0_90, %c0_91, %c0_92] : memref<2x1x32xf32, #tpu.memory_space<vmem>>, vector<1x1x32xf32>
    %192 = vector.shape_cast %191 : vector<1x1x32xf32> to vector<1x32xf32>
    %193 = vector.broadcast %192 : vector<1x32xf32> to vector<16x32xf32>
    %194 = arith.addf %190, %193 : vector<16x32xf32>
    %195 = arith.truncf %194 : vector<16x32xf32> to vector<16x32xbf16>
    %c1_93 = arith.constant 1 : index
    %c0_94 = arith.constant 0 : index
    %c0_95 = arith.constant 0 : index
    %196 = vector.load %arg3[%c1_93, %c0_94, %c0_95] : memref<2x32x96xbf16, #tpu.memory_space<vmem>>, vector<1x32x96xbf16>
    %197 = vector.shape_cast %196 : vector<1x32x96xbf16> to vector<32x96xbf16>
    %cst_96 = arith.constant dense<0.000000e+00> : vector<16x96xf32>
    %198 = tpu.matmul %195, %197, %cst_96 {dimension_numbers = #tpu.dot_dimension_numbers<[1], [0], [0], [1], [0, 0, 1, 1], [], []>} : vector<16x32xbf16>, vector<32x96xbf16>, vector<16x96xf32> -> vector<16x96xf32>
    %c1_97 = arith.constant 1 : index
    %c0_98 = arith.constant 0 : index
    %c0_99 = arith.constant 0 : index
    %199 = vector.load %arg4[%c1_97, %c0_98, %c0_99] : memref<2x1x96xf32, #tpu.memory_space<vmem>>, vector<1x1x96xf32>
    %200 = vector.shape_cast %199 : vector<1x1x96xf32> to vector<1x96xf32>
    %201 = vector.broadcast %200 : vector<1x96xf32> to vector<16x96xf32>
    %202 = arith.addf %198, %201 : vector<16x96xf32>
    %203 = vector.extract_strided_slice %202 {offsets = [0, 0], sizes = [16, 32], strides = [1, 1]} : vector<16x96xf32> to vector<16x32xf32>
    %cst_100 = arith.constant 0.353553385 : f32
    %204 = vector.broadcast %cst_100 : f32 to vector<16x32xf32>
    %205 = arith.mulf %203, %204 : vector<16x32xf32>
    %206 = vector.shape_cast %205 : vector<16x32xf32> to vector<2x8x32xf32>
    %207 = vector.extract_strided_slice %202 {offsets = [0, 32], sizes = [16, 32], strides = [1, 1]} : vector<16x96xf32> to vector<16x32xf32>
    %208 = vector.shape_cast %207 : vector<16x32xf32> to vector<2x8x32xf32>
    %209 = vector.extract_strided_slice %202 {offsets = [0, 64], sizes = [16, 32], strides = [1, 1]} : vector<16x96xf32> to vector<16x32xf32>
    %210 = vector.shape_cast %209 : vector<16x32xf32> to vector<2x8x32xf32>
    %211 = vector.extract_strided_slice %206 {offsets = [0, 0, 0], sizes = [2, 8, 8], strides = [1, 1, 1]} : vector<2x8x32xf32> to vector<2x8x8xf32>
    %212 = vector.extract_strided_slice %208 {offsets = [0, 0, 0], sizes = [2, 8, 8], strides = [1, 1, 1]} : vector<2x8x32xf32> to vector<2x8x8xf32>
    "tpu.trace_start"() <{level = 10 : i32, message = "bqd,bkd->bqk"}> : () -> ()
    %cst_101 = arith.constant dense<0.000000e+00> : vector<2x8x8xf32>
    %213 = tpu.matmul %211, %212, %cst_101 {dimension_numbers = #tpu.dot_dimension_numbers<[2], [2], [1], [1], [0, 0, 0, 1, 1, 1], [0], [0]>} : vector<2x8x8xf32>, vector<2x8x8xf32>, vector<2x8x8xf32> -> vector<2x8x8xf32>
    "tpu.trace_stop"() : () -> ()
    %cst_102 = arith.constant dense<0xFF800000> : vector<2x8xf32>
    %214 = vector.multi_reduction <maximumf>, %213, %cst_102 [2] : vector<2x8x8xf32> to vector<2x8xf32>
    %215 = vector.shape_cast %214 : vector<2x8xf32> to vector<2x8x1xf32>
    %216 = vector.broadcast %215 : vector<2x8x1xf32> to vector<2x8x8xf32>
    %217 = arith.subf %213, %216 : vector<2x8x8xf32>
    %218 = math.exp %217 : vector<2x8x8xf32>
    %cst_103 = arith.constant dense<0.000000e+00> : vector<2x8xf32>
    %219 = vector.multi_reduction <add>, %218, %cst_103 [2] : vector<2x8x8xf32> to vector<2x8xf32>
    %220 = vector.shape_cast %219 : vector<2x8xf32> to vector<2x8x1xf32>
    %221 = vector.broadcast %220 : vector<2x8x1xf32> to vector<2x8x8xf32>
    %222 = arith.divf %218, %221 : vector<2x8x8xf32>
    %223 = vector.extract_strided_slice %210 {offsets = [0, 0, 0], sizes = [2, 8, 8], strides = [1, 1, 1]} : vector<2x8x32xf32> to vector<2x8x8xf32>
    "tpu.trace_start"() <{level = 10 : i32, message = "bqk,bkd->bqd"}> : () -> ()
    %cst_104 = arith.constant dense<0.000000e+00> : vector<2x8x8xf32>
    %224 = tpu.matmul %222, %223, %cst_104 {dimension_numbers = #tpu.dot_dimension_numbers<[2], [1], [1], [2], [0, 0, 0, 1, 1, 2], [0], [0]>} : vector<2x8x8xf32>, vector<2x8x8xf32>, vector<2x8x8xf32> -> vector<2x8x8xf32>
    "tpu.trace_stop"() : () -> ()
    %225 = vector.extract_strided_slice %206 {offsets = [0, 0, 8], sizes = [2, 8, 8], strides = [1, 1, 1]} : vector<2x8x32xf32> to vector<2x8x8xf32>
    %226 = vector.extract_strided_slice %208 {offsets = [0, 0, 8], sizes = [2, 8, 8], strides = [1, 1, 1]} : vector<2x8x32xf32> to vector<2x8x8xf32>
    "tpu.trace_start"() <{level = 10 : i32, message = "bqd,bkd->bqk"}> : () -> ()
    %cst_105 = arith.constant dense<0.000000e+00> : vector<2x8x8xf32>
    %227 = tpu.matmul %225, %226, %cst_105 {dimension_numbers = #tpu.dot_dimension_numbers<[2], [2], [1], [1], [0, 0, 0, 1, 1, 1], [0], [0]>} : vector<2x8x8xf32>, vector<2x8x8xf32>, vector<2x8x8xf32> -> vector<2x8x8xf32>
    "tpu.trace_stop"() : () -> ()
    %cst_106 = arith.constant dense<0xFF800000> : vector<2x8xf32>
    %228 = vector.multi_reduction <maximumf>, %227, %cst_106 [2] : vector<2x8x8xf32> to vector<2x8xf32>
    %229 = vector.shape_cast %228 : vector<2x8xf32> to vector<2x8x1xf32>
    %230 = vector.broadcast %229 : vector<2x8x1xf32> to vector<2x8x8xf32>
    %231 = arith.subf %227, %230 : vector<2x8x8xf32>
    %232 = math.exp %231 : vector<2x8x8xf32>
    %cst_107 = arith.constant dense<0.000000e+00> : vector<2x8xf32>
    %233 = vector.multi_reduction <add>, %232, %cst_107 [2] : vector<2x8x8xf32> to vector<2x8xf32>
    %234 = vector.shape_cast %233 : vector<2x8xf32> to vector<2x8x1xf32>
    %235 = vector.broadcast %234 : vector<2x8x1xf32> to vector<2x8x8xf32>
    %236 = arith.divf %232, %235 : vector<2x8x8xf32>
    %237 = vector.extract_strided_slice %210 {offsets = [0, 0, 8], sizes = [2, 8, 8], strides = [1, 1, 1]} : vector<2x8x32xf32> to vector<2x8x8xf32>
    "tpu.trace_start"() <{level = 10 : i32, message = "bqk,bkd->bqd"}> : () -> ()
    %cst_108 = arith.constant dense<0.000000e+00> : vector<2x8x8xf32>
    %238 = tpu.matmul %236, %237, %cst_108 {dimension_numbers = #tpu.dot_dimension_numbers<[2], [1], [1], [2], [0, 0, 0, 1, 1, 2], [0], [0]>} : vector<2x8x8xf32>, vector<2x8x8xf32>, vector<2x8x8xf32> -> vector<2x8x8xf32>
    "tpu.trace_stop"() : () -> ()
    %239 = vector.extract_strided_slice %206 {offsets = [0, 0, 16], sizes = [2, 8, 8], strides = [1, 1, 1]} : vector<2x8x32xf32> to vector<2x8x8xf32>
    %240 = vector.extract_strided_slice %208 {offsets = [0, 0, 16], sizes = [2, 8, 8], strides = [1, 1, 1]} : vector<2x8x32xf32> to vector<2x8x8xf32>
    "tpu.trace_start"() <{level = 10 : i32, message = "bqd,bkd->bqk"}> : () -> ()
    %cst_109 = arith.constant dense<0.000000e+00> : vector<2x8x8xf32>
    %241 = tpu.matmul %239, %240, %cst_109 {dimension_numbers = #tpu.dot_dimension_numbers<[2], [2], [1], [1], [0, 0, 0, 1, 1, 1], [0], [0]>} : vector<2x8x8xf32>, vector<2x8x8xf32>, vector<2x8x8xf32> -> vector<2x8x8xf32>
    "tpu.trace_stop"() : () -> ()
    %cst_110 = arith.constant dense<0xFF800000> : vector<2x8xf32>
    %242 = vector.multi_reduction <maximumf>, %241, %cst_110 [2] : vector<2x8x8xf32> to vector<2x8xf32>
    %243 = vector.shape_cast %242 : vector<2x8xf32> to vector<2x8x1xf32>
    %244 = vector.broadcast %243 : vector<2x8x1xf32> to vector<2x8x8xf32>
    %245 = arith.subf %241, %244 : vector<2x8x8xf32>
    %246 = math.exp %245 : vector<2x8x8xf32>
    %cst_111 = arith.constant dense<0.000000e+00> : vector<2x8xf32>
    %247 = vector.multi_reduction <add>, %246, %cst_111 [2] : vector<2x8x8xf32> to vector<2x8xf32>
    %248 = vector.shape_cast %247 : vector<2x8xf32> to vector<2x8x1xf32>
    %249 = vector.broadcast %248 : vector<2x8x1xf32> to vector<2x8x8xf32>
    %250 = arith.divf %246, %249 : vector<2x8x8xf32>
    %251 = vector.extract_strided_slice %210 {offsets = [0, 0, 16], sizes = [2, 8, 8], strides = [1, 1, 1]} : vector<2x8x32xf32> to vector<2x8x8xf32>
    "tpu.trace_start"() <{level = 10 : i32, message = "bqk,bkd->bqd"}> : () -> ()
    %cst_112 = arith.constant dense<0.000000e+00> : vector<2x8x8xf32>
    %252 = tpu.matmul %250, %251, %cst_112 {dimension_numbers = #tpu.dot_dimension_numbers<[2], [1], [1], [2], [0, 0, 0, 1, 1, 2], [0], [0]>} : vector<2x8x8xf32>, vector<2x8x8xf32>, vector<2x8x8xf32> -> vector<2x8x8xf32>
    "tpu.trace_stop"() : () -> ()
    %253 = vector.extract_strided_slice %206 {offsets = [0, 0, 24], sizes = [2, 8, 8], strides = [1, 1, 1]} : vector<2x8x32xf32> to vector<2x8x8xf32>
    %254 = vector.extract_strided_slice %208 {offsets = [0, 0, 24], sizes = [2, 8, 8], strides = [1, 1, 1]} : vector<2x8x32xf32> to vector<2x8x8xf32>
    "tpu.trace_start"() <{level = 10 : i32, message = "bqd,bkd->bqk"}> : () -> ()
    %cst_113 = arith.constant dense<0.000000e+00> : vector<2x8x8xf32>
    %255 = tpu.matmul %253, %254, %cst_113 {dimension_numbers = #tpu.dot_dimension_numbers<[2], [2], [1], [1], [0, 0, 0, 1, 1, 1], [0], [0]>} : vector<2x8x8xf32>, vector<2x8x8xf32>, vector<2x8x8xf32> -> vector<2x8x8xf32>
    "tpu.trace_stop"() : () -> ()
    %cst_114 = arith.constant dense<0xFF800000> : vector<2x8xf32>
    %256 = vector.multi_reduction <maximumf>, %255, %cst_114 [2] : vector<2x8x8xf32> to vector<2x8xf32>
    %257 = vector.shape_cast %256 : vector<2x8xf32> to vector<2x8x1xf32>
    %258 = vector.broadcast %257 : vector<2x8x1xf32> to vector<2x8x8xf32>
    %259 = arith.subf %255, %258 : vector<2x8x8xf32>
    %260 = math.exp %259 : vector<2x8x8xf32>
    %cst_115 = arith.constant dense<0.000000e+00> : vector<2x8xf32>
    %261 = vector.multi_reduction <add>, %260, %cst_115 [2] : vector<2x8x8xf32> to vector<2x8xf32>
    %262 = vector.shape_cast %261 : vector<2x8xf32> to vector<2x8x1xf32>
    %263 = vector.broadcast %262 : vector<2x8x1xf32> to vector<2x8x8xf32>
    %264 = arith.divf %260, %263 : vector<2x8x8xf32>
    %265 = vector.extract_strided_slice %210 {offsets = [0, 0, 24], sizes = [2, 8, 8], strides = [1, 1, 1]} : vector<2x8x32xf32> to vector<2x8x8xf32>
    "tpu.trace_start"() <{level = 10 : i32, message = "bqk,bkd->bqd"}> : () -> ()
    %cst_116 = arith.constant dense<0.000000e+00> : vector<2x8x8xf32>
    %266 = tpu.matmul %264, %265, %cst_116 {dimension_numbers = #tpu.dot_dimension_numbers<[2], [1], [1], [2], [0, 0, 0, 1, 1, 2], [0], [0]>} : vector<2x8x8xf32>, vector<2x8x8xf32>, vector<2x8x8xf32> -> vector<2x8x8xf32>
    "tpu.trace_stop"() : () -> ()
    %267 = tpu.concatenate %224, %238, %252, %266 in 2 : vector<2x8x8xf32>, vector<2x8x8xf32>, vector<2x8x8xf32>, vector<2x8x8xf32> -> vector<2x8x32xf32>
    %268 = vector.shape_cast %267 : vector<2x8x32xf32> to vector<16x32xf32>
    %269 = arith.truncf %268 : vector<16x32xf32> to vector<16x32xbf16>
    %c1_117 = arith.constant 1 : index
    %c0_118 = arith.constant 0 : index
    %c0_119 = arith.constant 0 : index
    %270 = vector.load %arg5[%c1_117, %c0_118, %c0_119] : memref<2x32x32xbf16, #tpu.memory_space<vmem>>, vector<1x32x32xbf16>
    %271 = vector.shape_cast %270 : vector<1x32x32xbf16> to vector<32x32xbf16>
    %cst_120 = arith.constant dense<0.000000e+00> : vector<16x32xf32>
    %272 = tpu.matmul %269, %271, %cst_120 {dimension_numbers = #tpu.dot_dimension_numbers<[1], [0], [0], [1], [0, 0, 1, 1], [], []>} : vector<16x32xbf16>, vector<32x32xbf16>, vector<16x32xf32> -> vector<16x32xf32>
    %c1_121 = arith.constant 1 : index
    %c0_122 = arith.constant 0 : index
    %c0_123 = arith.constant 0 : index
    %273 = vector.load %arg6[%c1_121, %c0_122, %c0_123] : memref<2x1x32xf32, #tpu.memory_space<vmem>>, vector<1x1x32xf32>
    %274 = vector.shape_cast %273 : vector<1x1x32xf32> to vector<1x32xf32>
    %275 = vector.broadcast %274 : vector<1x32xf32> to vector<16x32xf32>
    %276 = arith.addf %272, %275 : vector<16x32xf32>
    %277 = arith.addf %194, %276 : vector<16x32xf32>
    %cst_124 = arith.constant dense<0.000000e+00> : vector<16xf32>
    %278 = vector.multi_reduction <add>, %277, %cst_124 [1] : vector<16x32xf32> to vector<16xf32>
    %279 = vector.shape_cast %278 : vector<16xf32> to vector<16x1xf32>
    %cst_125 = arith.constant 3.200000e+01 : f32
    %280 = vector.broadcast %cst_125 : f32 to vector<16x1xf32>
    %281 = arith.divf %279, %280 : vector<16x1xf32>
    %282 = vector.broadcast %281 : vector<16x1xf32> to vector<16x32xf32>
    %283 = arith.subf %277, %282 : vector<16x32xf32>
    %284 = arith.mulf %283, %283 : vector<16x32xf32>
    %cst_126 = arith.constant dense<0.000000e+00> : vector<16xf32>
    %285 = vector.multi_reduction <add>, %284, %cst_126 [1] : vector<16x32xf32> to vector<16xf32>
    %286 = vector.shape_cast %285 : vector<16xf32> to vector<16x1xf32>
    %cst_127 = arith.constant 3.200000e+01 : f32
    %287 = vector.broadcast %cst_127 : f32 to vector<16x1xf32>
    %288 = arith.divf %286, %287 : vector<16x1xf32>
    %289 = vector.broadcast %281 : vector<16x1xf32> to vector<16x32xf32>
    %290 = arith.subf %277, %289 : vector<16x32xf32>
    %cst_128 = arith.constant 9.99999974E-6 : f32
    %291 = vector.broadcast %cst_128 : f32 to vector<16x1xf32>
    %292 = arith.addf %288, %291 : vector<16x1xf32>
    %293 = math.rsqrt %292 : vector<16x1xf32>
    %294 = vector.broadcast %293 : vector<16x1xf32> to vector<16x32xf32>
    %295 = arith.mulf %290, %294 : vector<16x32xf32>
    %c1_129 = arith.constant 1 : index
    %c0_130 = arith.constant 0 : index
    %c0_131 = arith.constant 0 : index
    %296 = vector.load %arg7[%c1_129, %c0_130, %c0_131] : memref<2x1x32xf32, #tpu.memory_space<vmem>>, vector<1x1x32xf32>
    %297 = vector.shape_cast %296 : vector<1x1x32xf32> to vector<1x32xf32>
    %298 = vector.broadcast %297 : vector<1x32xf32> to vector<16x32xf32>
    %299 = arith.mulf %295, %298 : vector<16x32xf32>
    %c1_132 = arith.constant 1 : index
    %c0_133 = arith.constant 0 : index
    %c0_134 = arith.constant 0 : index
    %300 = vector.load %arg8[%c1_132, %c0_133, %c0_134] : memref<2x1x32xf32, #tpu.memory_space<vmem>>, vector<1x1x32xf32>
    %301 = vector.shape_cast %300 : vector<1x1x32xf32> to vector<1x32xf32>
    %302 = vector.broadcast %301 : vector<1x32xf32> to vector<16x32xf32>
    %303 = arith.addf %299, %302 : vector<16x32xf32>
    %304 = arith.truncf %303 : vector<16x32xf32> to vector<16x32xbf16>
    %c1_135 = arith.constant 1 : index
    %c0_136 = arith.constant 0 : index
    %c0_137 = arith.constant 0 : index
    %305 = vector.load %arg9[%c1_135, %c0_136, %c0_137] : memref<2x32x64xbf16, #tpu.memory_space<vmem>>, vector<1x32x64xbf16>
    %306 = vector.shape_cast %305 : vector<1x32x64xbf16> to vector<32x64xbf16>
    %cst_138 = arith.constant dense<0.000000e+00> : vector<16x64xf32>
    %307 = tpu.matmul %304, %306, %cst_138 {dimension_numbers = #tpu.dot_dimension_numbers<[1], [0], [0], [1], [0, 0, 1, 1], [], []>} : vector<16x32xbf16>, vector<32x64xbf16>, vector<16x64xf32> -> vector<16x64xf32>
    %c1_139 = arith.constant 1 : index
    %c0_140 = arith.constant 0 : index
    %c0_141 = arith.constant 0 : index
    %308 = vector.load %arg10[%c1_139, %c0_140, %c0_141] : memref<2x1x64xf32, #tpu.memory_space<vmem>>, vector<1x1x64xf32>
    %309 = vector.shape_cast %308 : vector<1x1x64xf32> to vector<1x64xf32>
    %310 = vector.broadcast %309 : vector<1x64xf32> to vector<16x64xf32>
    %311 = arith.addf %307, %310 : vector<16x64xf32>
    %cst_142 = arith.constant 0.000000e+00 : f32
    %312 = vector.broadcast %cst_142 : f32 to vector<16x64xf32>
    %313 = arith.maximumf %311, %312 : vector<16x64xf32>
    %314 = arith.truncf %313 : vector<16x64xf32> to vector<16x64xbf16>
    %c1_143 = arith.constant 1 : index
    %c0_144 = arith.constant 0 : index
    %c0_145 = arith.constant 0 : index
    %315 = vector.load %arg11[%c1_143, %c0_144, %c0_145] : memref<2x64x32xbf16, #tpu.memory_space<vmem>>, vector<1x64x32xbf16>
    %316 = vector.shape_cast %315 : vector<1x64x32xbf16> to vector<64x32xbf16>
    %cst_146 = arith.constant dense<0.000000e+00> : vector<16x32xf32>
    %317 = tpu.matmul %314, %316, %cst_146 {dimension_numbers = #tpu.dot_dimension_numbers<[1], [0], [0], [1], [0, 0, 1, 1], [], []>} : vector<16x64xbf16>, vector<64x32xbf16>, vector<16x32xf32> -> vector<16x32xf32>
    %c1_147 = arith.constant 1 : index
    %c0_148 = arith.constant 0 : index
    %c0_149 = arith.constant 0 : index
    %318 = vector.load %arg12[%c1_147, %c0_148, %c0_149] : memref<2x1x32xf32, #tpu.memory_space<vmem>>, vector<1x1x32xf32>
    %319 = vector.shape_cast %318 : vector<1x1x32xf32> to vector<1x32xf32>
    %320 = vector.broadcast %319 : vector<1x32xf32> to vector<16x32xf32>
    %321 = arith.addf %317, %320 : vector<16x32xf32>
    %322 = arith.addf %303, %321 : vector<16x32xf32>
    %cst_150 = arith.constant dense<0.000000e+00> : vector<16xf32>
    %323 = vector.multi_reduction <add>, %322, %cst_150 [1] : vector<16x32xf32> to vector<16xf32>
    %324 = vector.shape_cast %323 : vector<16xf32> to vector<16x1xf32>
    %cst_151 = arith.constant 3.200000e+01 : f32
    %325 = vector.broadcast %cst_151 : f32 to vector<16x1xf32>
    %326 = arith.divf %324, %325 : vector<16x1xf32>
    %327 = vector.broadcast %326 : vector<16x1xf32> to vector<16x32xf32>
    %328 = arith.subf %322, %327 : vector<16x32xf32>
    %329 = arith.mulf %328, %328 : vector<16x32xf32>
    %cst_152 = arith.constant dense<0.000000e+00> : vector<16xf32>
    %330 = vector.multi_reduction <add>, %329, %cst_152 [1] : vector<16x32xf32> to vector<16xf32>
    %331 = vector.shape_cast %330 : vector<16xf32> to vector<16x1xf32>
    %cst_153 = arith.constant 3.200000e+01 : f32
    %332 = vector.broadcast %cst_153 : f32 to vector<16x1xf32>
    %333 = arith.divf %331, %332 : vector<16x1xf32>
    %334 = vector.broadcast %326 : vector<16x1xf32> to vector<16x32xf32>
    %335 = arith.subf %322, %334 : vector<16x32xf32>
    %cst_154 = arith.constant 9.99999974E-6 : f32
    %336 = vector.broadcast %cst_154 : f32 to vector<16x1xf32>
    %337 = arith.addf %333, %336 : vector<16x1xf32>
    %338 = math.rsqrt %337 : vector<16x1xf32>
    %339 = vector.broadcast %338 : vector<16x1xf32> to vector<16x32xf32>
    %340 = arith.mulf %335, %339 : vector<16x32xf32>
    %c1_155 = arith.constant 1 : index
    %c0_156 = arith.constant 0 : index
    %c0_157 = arith.constant 0 : index
    %341 = vector.load %arg13[%c1_155, %c0_156, %c0_157] : memref<2x1x32xf32, #tpu.memory_space<vmem>>, vector<1x1x32xf32>
    %342 = vector.shape_cast %341 : vector<1x1x32xf32> to vector<1x32xf32>
    %343 = vector.broadcast %342 : vector<1x32xf32> to vector<16x32xf32>
    %344 = arith.mulf %340, %343 : vector<16x32xf32>
    %c1_158 = arith.constant 1 : index
    %c0_159 = arith.constant 0 : index
    %c0_160 = arith.constant 0 : index
    %345 = vector.load %arg14[%c1_158, %c0_159, %c0_160] : memref<2x1x32xf32, #tpu.memory_space<vmem>>, vector<1x1x32xf32>
    %346 = vector.shape_cast %345 : vector<1x1x32xf32> to vector<1x32xf32>
    %347 = vector.broadcast %346 : vector<1x32xf32> to vector<16x32xf32>
    %348 = arith.addf %344, %347 : vector<16x32xf32>
    %349 = vector.shape_cast %348 : vector<16x32xf32> to vector<2x8x32xf32>
    %350 = vector.extract_strided_slice %349 {offsets = [0, 0, 0], sizes = [2, 1, 32], strides = [1, 1, 1]} : vector<2x8x32xf32> to vector<2x1x32xf32>
    %351 = vector.shape_cast %350 : vector<2x1x32xf32> to vector<2x32xf32>
    %352 = vector.extract_strided_slice %349 {offsets = [0, 1, 0], sizes = [2, 1, 32], strides = [1, 1, 1]} : vector<2x8x32xf32> to vector<2x1x32xf32>
    %353 = vector.shape_cast %352 : vector<2x1x32xf32> to vector<2x32xf32>
    %354 = vector.extract_strided_slice %349 {offsets = [0, 2, 0], sizes = [2, 1, 32], strides = [1, 1, 1]} : vector<2x8x32xf32> to vector<2x1x32xf32>
    %355 = vector.shape_cast %354 : vector<2x1x32xf32> to vector<2x32xf32>
    %356 = vector.extract_strided_slice %349 {offsets = [0, 3, 0], sizes = [2, 1, 32], strides = [1, 1, 1]} : vector<2x8x32xf32> to vector<2x1x32xf32>
    %357 = vector.shape_cast %356 : vector<2x1x32xf32> to vector<2x32xf32>
    %358 = vector.extract_strided_slice %349 {offsets = [0, 4, 0], sizes = [2, 1, 32], strides = [1, 1, 1]} : vector<2x8x32xf32> to vector<2x1x32xf32>
    %359 = vector.shape_cast %358 : vector<2x1x32xf32> to vector<2x32xf32>
    %360 = vector.extract_strided_slice %349 {offsets = [0, 5, 0], sizes = [2, 1, 32], strides = [1, 1, 1]} : vector<2x8x32xf32> to vector<2x1x32xf32>
    %361 = vector.shape_cast %360 : vector<2x1x32xf32> to vector<2x32xf32>
    %362 = vector.extract_strided_slice %349 {offsets = [0, 6, 0], sizes = [2, 1, 32], strides = [1, 1, 1]} : vector<2x8x32xf32> to vector<2x1x32xf32>
    %363 = vector.shape_cast %362 : vector<2x1x32xf32> to vector<2x32xf32>
    %364 = vector.extract_strided_slice %349 {offsets = [0, 7, 0], sizes = [2, 1, 32], strides = [1, 1, 1]} : vector<2x8x32xf32> to vector<2x1x32xf32>
    %365 = vector.shape_cast %364 : vector<2x1x32xf32> to vector<2x32xf32>
    %366 = tpu.concatenate %351, %353, %355, %357, %359, %361, %363, %365 in 1 : vector<2x32xf32>, vector<2x32xf32>, vector<2x32xf32>, vector<2x32xf32>, vector<2x32xf32>, vector<2x32xf32>, vector<2x32xf32>, vector<2x32xf32> -> vector<2x256xf32>
    %c0_161 = arith.constant 0 : index
    %c0_162 = arith.constant 0 : index
    %367 = vector.load %arg15[%c0_161, %c0_162] : memref<2x256xf32, #tpu.memory_space<vmem>>, vector<2x256xf32>
    tpu.vector_store %arg15[%c0_161, %c0_162], %366 {strides = array<i32>} : memref<2x256xf32, #tpu.memory_space<vmem>>, vector<2x256xf32>,
    return
  }
}

</mosaic_0001>

<bundles_post_ra>
// kernel: transformer_encoder_forward.1
= control target key start
LH: loop header
LB: loop body
LE: loop exit
PB: predicated region body
PF: predicated region fallthrough
CT: control target
= control target key end

     0   :  { %s5424_s0 = inlined_call_operand.hbm [shape: f32[2,32], index: 0, kind: input, shape index: {}]   ;;  %s5425_s1 = inlined_call_operand.vmem [shape: bf16[32,256], index: 1, kind: input, shape index: {}]   ;;  %s5426_s2 = inlined_call_operand.vmem [shape: f32[1,256], index: 2, kind: input, shape index: {}]   ;;  %s5427_s3 = inlined_call_operand.vmem [shape: bf16[2,32,96], index: 3, kind: input, shape index: {}]   ;;  %s5428_s4 = inlined_call_operand.vmem [shape: f32[2,1,96], index: 4, kind: input, shape index: {}]   ;;  %s5429_s5 = inlined_call_operand.vmem [shape: bf16[2,32,32], index: 5, kind: input, shape index: {}]   ;;  %s5430_s6 = inlined_call_operand.vmem [shape: f32[2,1,32], index: 6, kind: input, shape index: {}]   ;;  %s5431_s7 = inlined_call_operand.vmem [shape: f32[2,1,32], index: 7, kind: input, shape index: {}]   ;;  %s5432_s8 = inlined_call_operand.hbm [shape: f32[2,1,32], index: 8, kind: input, shape index: {}]   ;;  %s5433_s9 = inlined_call_operand.hbm [shape: bf16[2,32,64], index: 9, kind: input, shape index: {}]   ;;  %s5434_s10 = inlined_call_operand.hbm [shape: f32[2,1,64], index: 10, kind: input, shape index: {}]   ;;  %s5435_s11 = inlined_call_operand.vmem [shape: bf16[2,64,32], index: 11, kind: input, shape index: {}]   ;;  %s5436_s12 = inlined_call_operand.hbm [shape: f32[2,1,32], index: 12, kind: input, shape index: {}]   ;;  %s5437_s13 = inlined_call_operand.hbm [shape: f32[2,1,32], index: 13, kind: input, shape index: {}]   ;;  %s5438_s14 = inlined_call_operand.hbm [shape: f32[2,1,32], index: 14, kind: input, shape index: {}]   ;;  %s5439_s15 = inlined_call_operand.vmem [shape: f32[2,256], index: 15, kind: output, shape index: {}]  }
   0x1   :  { %5440 = sst [smem:[#allocation18_spill]] %s5439_s15 }
   0x2   :  { %20 = vsyncpa [#allocation4], 0 }
   0x3   :  { %21 = vsyncpa [#allocation6], 0 }
   0x4   :  { %22 = vsyncpa [#allocation9], 0 }
   0x5   :  { %23 = vsyncpa [#allocation12], 0  ;;  %s4672_s18 = smov [#allocation5]   ;;  %s4510_s22 = scalar_lea.hbm %s5432_s8, 32 }
   0x6   :  { %s53_s19 = sshll.u32 %s4672_s18, 4  ;;  %p4511_p0 = scmp.ne.s32.totalorder %s5432_s8, %s4510_s22  ;;  %s54_s19 = int_to_ptr.vmem [resolvable:$true] %s53_s19 }
   0x7   :  { %p4514_p1 = scmp.lt.u32.totalorder %s4510_s22, %s5432_s8 }
   0x9   :  { %p4516_p2 = pnand %p4514_p1, %p4511_p0 }
   0xb   :  { %4519 = shalt.err (!%p4516_p2)
}
   0xc   :  { %s4520_s27 = scalar_lea.vmem %s54_s19, 32  ;;  %p4525_p4 = scmp.lt.s32.totalorder %s54_s19, %s54_s19 }
   0xd   :  { %p4521_p3 = scmp.ne.s32.totalorder %s54_s19, %s4520_s27  ;;  %p4526_p5 = scmp.lt.s32.totalorder %s4520_s27, %s4520_s27 }
   0xf   :  { %p4527_p6 = por %p4526_p5, %p4525_p4 }
  0x11   :  { %p4528_p7 = pnand %p4527_p6, %p4521_p3 }
  0x13   :  { %4531 = shalt.err (!%p4528_p7)
}
  0x14   :  { %s4673_s28 = smov 16   ;;  %s4674_s29 = smov 1  }
  0x15   :  { %59 = dma.hbm_to_vmem [thread:$0]  %s5432_s8, 32, %s54_s19, [#allocation6], %s4673_s28, %s4673_s28, %s4674_s29  }
  0x16   :  { %s4675_s17 = smov [#allocation8]   ;;  %s4676_s20 = smov [#allocation11]  }
  0x17   :  { %s77_s18 = sshll.u32 %s4675_s17, 4  ;;  %s103_s21 = sshll.u32 %s4676_s20, 4  ;;  %s78_s18 = int_to_ptr.vmem [resolvable:$true] %s77_s18  ;;  %s104_s21 = int_to_ptr.vmem [resolvable:$true] %s103_s21 }
  0x18   :  { %s4532_s24 = scalar_lea.hbm %s5434_s10, 32 }
  0x19   :  { %p4533_p8 = scmp.ne.s32.totalorder %s5434_s10, %s4532_s24  ;;  %p4536_p9 = scmp.lt.u32.totalorder %s4532_s24, %s5434_s10 }
  0x1b   :  { %p4538_p10 = pnand %p4536_p9, %p4533_p8 }
  0x1d   :  { %4541 = shalt.err (!%p4538_p10)
}
  0x1e   :  { %s4542_s8 = scalar_lea.vmem %s78_s18, 32  ;;  %p4547_p12 = scmp.lt.s32.totalorder %s78_s18, %s78_s18 }
  0x1f   :  { %p4543_p11 = scmp.ne.s32.totalorder %s78_s18, %s4542_s8  ;;  %p4548_p13 = scmp.lt.s32.totalorder %s4542_s8, %s4542_s8 }
  0x21   :  { %p4549_p0 = por %p4548_p13, %p4547_p12 }
  0x23   :  { %p4550_p1 = pnand %p4549_p0, %p4543_p11 }
  0x25   :  { %4553 = shalt.err (!%p4550_p1)
}
  0x26   :  { %83 = dma.hbm_to_vmem [thread:$0]  %s5434_s10, 32, %s78_s18, [#allocation9], %s4673_s28, %s4673_s28, %s4674_s29  }
  0x27   :  { %s4554_s17 = scalar_lea.hbm %s5437_s13, 32 }
  0x28   :  { %p4555_p2 = scmp.ne.s32.totalorder %s5437_s13, %s4554_s17  ;;  %p4558_p3 = scmp.lt.u32.totalorder %s4554_s17, %s5437_s13 }
  0x2a   :  { %p4560_p4 = pnand %p4558_p3, %p4555_p2 }
  0x2c   :  { %4563 = shalt.err (!%p4560_p4)
}
  0x2d   :  { %s4564_s25 = scalar_lea.vmem %s104_s21, 32  ;;  %p4569_p6 = scmp.lt.s32.totalorder %s104_s21, %s104_s21 }
  0x2e   :  { %p4565_p5 = scmp.ne.s32.totalorder %s104_s21, %s4564_s25  ;;  %p4570_p7 = scmp.lt.s32.totalorder %s4564_s25, %s4564_s25 }
  0x30   :  { %p4571_p8 = por %p4570_p7, %p4569_p6 }
  0x32   :  { %p4572_p9 = pnand %p4571_p8, %p4565_p5 }
  0x34   :  { %4575 = shalt.err (!%p4572_p9)
}
  0x35   :  { %109 = dma.hbm_to_vmem [thread:$0]  %s5437_s13, 32, %s104_s21, [#allocation12], %s4673_s28, %s4673_s28, %s4674_s29  }
  0x36   :  { %s4677_s26 = smov [#allocation3]   ;;  %s4678_s8 = smov [#allocation7]  }
  0x37   :  { %s30_s27 = sshll.u32 %s4677_s26, 4  ;;  %s65_s19 = sshll.u32 %s4678_s8, 4  ;;  %s31_s27 = int_to_ptr.vmem [resolvable:$true] %s30_s27  ;;  %s66_s19 = int_to_ptr.vmem [resolvable:$true] %s65_s19 }
  0x38   :  { %s4576_s15 = scalar_lea.hbm %s5424_s0, 32 }
  0x39   :  { %p4577_p10 = scmp.ne.s32.totalorder %s5424_s0, %s4576_s15  ;;  %p4580_p11 = scmp.lt.u32.totalorder %s4576_s15, %s5424_s0 }
  0x3b   :  { %p4582_p12 = pnand %p4580_p11, %p4577_p10 }
  0x3d   :  { %4585 = shalt.err (!%p4582_p12)
}
  0x3e   :  { %s4586_s13 = scalar_lea.vmem %s31_s27, 32  ;;  %p4591_p0 = scmp.lt.s32.totalorder %s31_s27, %s31_s27 }
  0x3f   :  { %p4587_p13 = scmp.ne.s32.totalorder %s31_s27, %s4586_s13  ;;  %p4592_p1 = scmp.lt.s32.totalorder %s4586_s13, %s4586_s13 }
  0x41   :  { %p4593_p2 = por %p4592_p1, %p4591_p0 }
  0x43   :  { %p4594_p3 = pnand %p4593_p2, %p4587_p13 }
  0x45   :  { %4597 = shalt.err (!%p4594_p3)
}
  0x46   :  { %33 = dma.hbm_to_vmem [thread:$0]  %s5424_s0, 32, %s31_s27, [#allocation4]  }
  0x47   :  { %s4598_s18 = scalar_lea.hbm %s5433_s9, 512 }
  0x48   :  { %p4599_p4 = scmp.ne.s32.totalorder %s5433_s9, %s4598_s18  ;;  %p4602_p5 = scmp.lt.u32.totalorder %s4598_s18, %s5433_s9 }
  0x4a   :  { %p4604_p6 = pnand %p4602_p5, %p4599_p4 }
  0x4c   :  { %4607 = shalt.err (!%p4604_p6)
}
  0x4d   :  { %s4608_s15 = scalar_lea.vmem %s66_s19, 512  ;;  %p4613_p8 = scmp.lt.s32.totalorder %s66_s19, %s66_s19 }
  0x4e   :  { %p4609_p7 = scmp.ne.s32.totalorder %s66_s19, %s4608_s15  ;;  %p4614_p9 = scmp.lt.s32.totalorder %s4608_s15, %s4608_s15 }
  0x50   :  { %p4615_p10 = por %p4614_p9, %p4613_p8 }
  0x52   :  { %p4616_p11 = pnand %p4615_p10, %p4609_p7 }
  0x54   :  { %4619 = shalt.err (!%p4616_p11)
}
  0x55   :  { %s4679_s0 = smov 64   ;;  %s4680_s27 = smov 4  }
  0x56   :  { %71 = dma.hbm_to_vmem [thread:$0]  %s5433_s9, 512, %s66_s19, [#allocation6], %s4679_s0, %s4679_s0, %s4680_s27  }
  0x57   :  { %s4681_s22 = smov [#allocation10]   ;;  %s4682_s13 = smov [#allocation13]  }
  0x58   :  { %s91_s23 = sshll.u32 %s4681_s22, 4  ;;  %s115_s21 = sshll.u32 %s4682_s13, 4  ;;  %s92_s23 = int_to_ptr.vmem [resolvable:$true] %s91_s23  ;;  %s116_s21 = int_to_ptr.vmem [resolvable:$true] %s115_s21 }
  0x59   :  { %s4620_s10 = scalar_lea.hbm %s5436_s12, 32 }
  0x5a   :  { %p4621_p12 = scmp.ne.s32.totalorder %s5436_s12, %s4620_s10  ;;  %p4624_p13 = scmp.lt.u32.totalorder %s4620_s10, %s5436_s12 }
  0x5c   :  { %p4626_p0 = pnand %p4624_p13, %p4621_p12 }
  0x5e   :  { %4629 = shalt.err (!%p4626_p0)
}
  0x5f   :  { %s4630_s9 = scalar_lea.vmem %s92_s23, 32  ;;  %p4635_p2 = scmp.lt.s32.totalorder %s92_s23, %s92_s23 }
  0x60   :  { %p4631_p1 = scmp.ne.s32.totalorder %s92_s23, %s4630_s9  ;;  %p4636_p3 = scmp.lt.s32.totalorder %s4630_s9, %s4630_s9 }
  0x62   :  { %p4637_p4 = por %p4636_p3, %p4635_p2 }
  0x64   :  { %p4638_p5 = pnand %p4637_p4, %p4631_p1 }
  0x66   :  { %4641 = shalt.err (!%p4638_p5)
}
  0x67   :  { %97 = dma.hbm_to_vmem [thread:$0]  %s5436_s12, 32, %s92_s23, [#allocation9], %s4673_s28, %s4673_s28, %s4674_s29  }
  0x68   :  { %s4642_s17 = scalar_lea.hbm %s5438_s14, 32 }
  0x69   :  { %p4643_p6 = scmp.ne.s32.totalorder %s5438_s14, %s4642_s17  ;;  %p4646_p7 = scmp.lt.u32.totalorder %s4642_s17, %s5438_s14 }
  0x6b   :  { %p4648_p8 = pnand %p4646_p7, %p4643_p6 }
  0x6d   :  { %4651 = shalt.err (!%p4648_p8)
}
  0x6e   :  { %s4652_s25 = scalar_lea.vmem %s116_s21, 32  ;;  %p4657_p10 = scmp.lt.s32.totalorder %s116_s21, %s116_s21 }
  0x6f   :  { %p4653_p9 = scmp.ne.s32.totalorder %s116_s21, %s4652_s25  ;;  %p4658_p11 = scmp.lt.s32.totalorder %s4652_s25, %s4652_s25 }
  0x71   :  { %p4659_p12 = por %p4658_p11, %p4657_p10 }
  0x73   :  { %p4660_p13 = pnand %p4659_p12, %p4653_p9 }
  0x75   :  { %4663 = shalt.err (!%p4660_p13)
}
  0x76   :  { %121 = dma.hbm_to_vmem [thread:$0]  %s5438_s14, 32, %s116_s21, [#allocation12], %s4673_s28, %s4673_s28, %s4674_s29  }
  0x77   :  { %4664 = dma.done.wait [#allocation4], 32  }
  0x78   :  { %4665 = vsyncadd [#allocation4], 4294967264 }
  0x79   :  { %4666 = dma.done.wait [#allocation6], 544  }
  0x7a   :  { %4667 = vsyncadd [#allocation6], 4294966752 }
  0x7b   :  { %4668 = dma.done.wait [#allocation9], 64  }
  0x7c   :  { %4669 = vsyncadd [#allocation9], 4294967232 }
  0x7d   :  { %4670 = dma.done.wait [#allocation12], 64  }
  0x7e   :  { %4671 = vsyncadd [#allocation12], 4294967232  ;;  %v4683_v0 = vmov 0   ;;  %v4404_v1 = vld [vmem:[%s5425_s1 + $0x4] ss:$8 sps:$4 sm:$0xff]   ;;  %vm182_vm0 = vcmask 261120   ;;  %v152_v7 = vlaneseq }
  0x7f   :  { %218 = vmatprep.mubr.bf16.mxu1 %v4683_v0  ;;  %v4406_v2 = vld [vmem:[%s5425_s1] ss:$8 sps:$4 sm:$0xff]   ;;  %186 = vmatprep.subr.bf16.mxu1 %v4404_v1  ;;  %v4407_v3 = vld [vmem:[%s5425_s1 + $0x14] ss:$8 sps:$4 sm:$0xff]   ;;  %v4409_v4 = vld [vmem:[%s5425_s1 + $0x10] ss:$8 sps:$4 sm:$0xff]  }
  0x80   :  { %187 = vmatpush1.bf16.msra.mxu1 %v4406_v2  ;;  %v144_v5 = vld [vmem:[#allocation3] sm:$0x3]  ;;  %v153_v8 = vshrl.u32 %v152_v7, 7  ;;  %v4684_v9 = vmov 1966171168   ;;  %vm252_vm1 = vcmask 253952  }
  0x81   :  { %188 = vmatprep.subr.bf16.mxu1 %v4407_v3  ;;  %v145_v6 = vpack.c.bf16 %v144_v5, %v144_v5  ;;  %v229_v10 = vunpack.c.l.s4 %v4684_v9  ;;  %v150_v12 = vld [vmem:[%s5426_s2] sm:$0x3]  ;;  %s4685_s1 = smov 96   ;;  %s4686_s2 = smov 32   ;;  %v4687_v36 = vmov 0.0   ;;  %vm4688_vm2 = vmmov 0  }
  0x82   :  { %v154_v11 = vsub.s32 0, %v153_v8  ;;  %v158_v13 = vsub.s32 1, %v153_v8  ;;  %v4410_v35 = vld [vmem:[%s5427_s3] sm:$0xff]   ;;  %v4411_v38 = vld [vmem:[%s5427_s3 + $0x8] sm:$0xff]   ;;  %4122 = vmatprep.subr.mxu0 %v4687_v36  ;;  %4124 = vmatprep.mubr.msk.f32.mxu0 %vm4688_vm2, %v4687_v36  ;;  %vm421_vm3 = vcmask 64512   ;;  %s4689_s13 = smov 88  }
  0x83   :  { %v230_v14 = vunpack.c.0.s8 %v229_v10  ;;  %v3910_v54 = vld [vmem:[%s5428_s4] ss:$0 sm:$0xff]  ;;  %s4690_s24 = smov 120   ;;  %s4691_s25 = smov 56   ;;  %vm1765_vm4 = vcmask 130048   ;;  %vm1768_vm5 = vcmask 195584  }
  0x84   :  { %189 = vmatpush1.bf16.msra.mxu1 %v4409_v4  ;;  %v155_v15 = vrot.slane %v150_v12, %v154_v11  ;;  %v159_v16 = vrot.slane %v150_v12, %v158_v13  ;;  %s4692_s12 = smov 80   ;;  %s4693_s23 = smov 112   ;;  %vm1996_vm6 = vcmask 523264   ;;  %vm3836_vm7 = vcmask 1041409  }
  0x85   :  { %v233_v17 = vsub.s32 %v230_v14, %v153_v8  ;;  %4114 = vmatprep.subr.bf16.mxu1 %v4687_v36  ;;  %s4694_s10 = smov 48   ;;  %s4695_s18 = smov 72   ;;  %vm3880_vm8 = vcmask 785408  }
  0x86   :  { %s4696_s26 = smov 104   ;;  %s4697_s8 = smov 40  }
  0x87   :  { %3909 = vmatmul.mubr.msk.bf16.vlgmr.msra.gmra.mrb[0].mxu1 %vm182_vm0, %v145_v6  ;;  %s4698_s14 = smov 8   ;;  %s4699_s19 = smov 24  }
  0x88   :  { %4118 = vmatprep.mubr.msk.bf16.mxu1 %vm4688_vm2, %v4687_v36  ;;  %4115 = vmatpush3.bf16.msra.mxu1 %v4410_v35 }
  0x89   :  { %4116 = vmatprep.subr.bf16.mxu1 %v4687_v36 }
  0x8c   :  { %4117 = vmatpush3.bf16.msra.mxu1 %v4411_v38 }
  0x8d   :  { %4127 = vmatprep.subr.mxu1 %v4687_v36 }
 0x15a   :  { %v220_v18 = vpop.f32.mrb[0].mxu1 }
 0x15b   :  { %v221_v19 = vadd.f32 %v220_v18, %v155_v15  ;;  %v222_v20 = vpop.f32.mrb[1].mxu1 }
 0x15c   :  { %v223_v21 = vadd.f32 %v222_v20, %v159_v16  ;;  %v224_v22 = vpop.f32.mrb[2].mxu1 }
 0x15d   :  { %v234_v23 = vrot.slane %v221_v19, %v233_v17  ;;  %v225_v24 = vpop.f32.mrb[3].mxu1 }
 0x15e   :  { %v294_v25 = vrot.slane %v223_v21, %v233_v17 }
 0x15f   :  { %v235_v26 = vcombine.high %v234_v23, %v234_v23  ;;  %v242_v27 = vrot.slane %v234_v23, %v233_v17 }
 0x160   :  { %v295_v28 = vcombine.high %v294_v25, %v294_v25  ;;  %v302_v29 = vrot.slane %v294_v25, %v233_v17 }
 0x161   :  { %253 = vst.msk [vmem:[#allocation2] sm:$0x1] %vm252_vm1, %v242_v27  ;;  %v258_v30 = vrot.slane %v242_v27, %v154_v11  ;;  %v249_v31 = vrot.slane %v235_v26, %v233_v17 }
 0x162   :  { %312 = vst.msk [vmem:[#allocation2 + $0x4] sm:$0x1] %vm252_vm1, %v302_v29  ;;  %v309_v32 = vrot.slane %v295_v28, %v233_v17  ;;  %v317_v34 = vrot.slane %v302_v29, %v154_v11 }
 0x163   :  { %271 = vrot.lane.b32.xlu1 %v258_v30, %s4679_s0  ;;  %263 = vrot.lane.b32.xlu0 %v258_v30, %s4685_s1  ;;  %254 = vst.msk [vmem:[#allocation2 + $0x8] sm:$0x1] %vm252_vm1, %v249_v31  ;;  %v262_v33 = vrot.slane %v249_v31, %v154_v11 }
 0x164   :  { %313 = vst.msk [vmem:[#allocation2 + $0xc] sm:$0x1] %vm252_vm1, %v309_v32  ;;  %v321_v37 = vrot.slane %v309_v32, %v154_v11 }
 0x167   :  { %279 = vrot.lane.b32.xlu0 %v258_v30, %s4686_s2  ;;  %273 = vrot.lane.b32.xlu1 %v262_v33, %s4679_s0 }
 0x16b   :  { %322 = vrot.lane.b32.xlu0 %v317_v34, %s4685_s1  ;;  %281 = vrot.lane.b32.xlu1 %v262_v33, %s4686_s2 }
 0x16f   :  { %330 = vrot.lane.b32.xlu0 %v317_v34, %s4679_s0  ;;  %324 = vrot.lane.b32.xlu1 %v321_v37, %s4685_s1 }
 0x173   :  { %332 = vrot.lane.b32.xlu1 %v321_v37, %s4679_s0  ;;  %265 = vrot.lane.b32.xlu0 %v262_v33, %s4685_s1 }
 0x177   :  { %340 = vrot.lane.b32.xlu1 %v321_v37, %s4686_s2  ;;  %338 = vrot.lane.b32.xlu0 %v317_v34, %s4686_s2 }
 0x1d5   :  { %v272_v39 = vpop.permute.xlu1 %271  ;;  %v264_v40 = vpop.permute.xlu0 %263 }
 0x1d6   :  { %277 = vst.msk [vmem:[#allocation2 + $0x2] sm:$0x1] %vm252_vm1, %v272_v39  ;;  %269 = vst.msk [vmem:[#allocation2 + $0x1] sm:$0x1] %vm252_vm1, %v264_v40 }
 0x1d9   :  { %v280_v41 = vpop.permute.xlu0 %279  ;;  %v274_v42 = vpop.permute.xlu1 %273 }
 0x1da   :  { %285 = vst.msk [vmem:[#allocation2 + $0x3] sm:$0x1] %vm252_vm1, %v280_v41  ;;  %278 = vst.msk [vmem:[#allocation2 + $0xa] sm:$0x1] %vm252_vm1, %v274_v42 }
 0x1dd   :  { %v323_v43 = vpop.permute.xlu0 %322  ;;  %v282_v44 = vpop.permute.xlu1 %281 }
 0x1de   :  { %328 = vst.msk [vmem:[#allocation2 + $0x5] sm:$0x1] %vm252_vm1, %v323_v43  ;;  %286 = vst.msk [vmem:[#allocation2 + $0xb] sm:$0x1] %vm252_vm1, %v282_v44 }
 0x1e1   :  { %v331_v45 = vpop.permute.xlu0 %330  ;;  %v325_v46 = vpop.permute.xlu1 %324 }
 0x1e2   :  { %336 = vst.msk [vmem:[#allocation2 + $0x6] sm:$0x1] %vm252_vm1, %v331_v45  ;;  %329 = vst.msk [vmem:[#allocation2 + $0xd] sm:$0x1] %vm252_vm1, %v325_v46 }
 0x1e5   :  { %v333_v47 = vpop.permute.xlu1 %332  ;;  %v266_v48 = vpop.permute.xlu0 %265 }
 0x1e6   :  { %337 = vst.msk [vmem:[#allocation2 + $0xe] sm:$0x1] %vm252_vm1, %v333_v47  ;;  %270 = vst.msk [vmem:[#allocation2 + $0x9] sm:$0x1] %vm252_vm1, %v266_v48 }
 0x1e9   :  { %v341_v49 = vpop.permute.xlu1 %340  ;;  %v339_v50 = vpop.permute.xlu0 %338 }
 0x1ea   :  { %345 = vst.msk [vmem:[#allocation2 + $0xf] sm:$0x1] %vm252_vm1, %v341_v49  ;;  %344 = vst.msk [vmem:[#allocation2 + $0x7] sm:$0x1] %vm252_vm1, %v339_v50 }
 0x1f1   :  { %v4939_v51 = vld [vmem:[#allocation2] sm:$0xff]  ;;  %v4941_v52 = vld [vmem:[#allocation2 + $0x8] sm:$0xff] }
 0x1f2   :  { %v348_v53 = vpack.c.bf16 %v4941_v52, %v4939_v51 }
 0x1f4   :  { %4119 = vmatmul.mubr.msk.bf16.vlgmr.msra.gmra.mrb[4].mxu1 %vm182_vm0, %v348_v53 }
 0x1f5   :  { %4129 = vmatprep.mubr.msk.f32.mxu1 %vm4688_vm2, %v4687_v36 }
 0x2c7   :  { %v409_v55 = vpop.f32.mrb[4].mxu1 }
 0x2c8   :  { %v4951_v56 = vadd.f32 %v3910_v54, %v409_v55  ;;  %v4120_v57 = vpop.f32.mrb[5].mxu1 }
 0x2c9   :  { %v412_v58 = vpop.f32.mrb[6].mxu1 }
 0x2ca   :  { %v4953_v59 = vadd.f32 %v3910_v54, %v412_v58  ;;  %419 = vrot.lane.b32.xlu0 %v4951_v56, %s4685_s1  ;;  %v4121_v60 = vpop.f32.mrb[7].mxu1  ;;  %v4961_v63 = vmul.f32 0.35355338, %v4951_v56 }
 0x2cc   :  { %498 = vrot.lane.b32.xlu1 %v4953_v59, %s4685_s1  ;;  %v4968_v0 = vmul.f32 0.35355338, %v4953_v59 }
 0x33c   :  { %v420_v61 = vpop.permute.xlu0 %419 }
 0x33d   :  { %4123 = vmatpush3.xpose.msk.msra.mxu0 %vm421_vm3, %v420_v61 }
 0x33e   :  { %v499_v62 = vpop.permute.xlu1 %498  ;;  %4132 = vmatprep.subr.mxu0 %v4687_v36 }
 0x33f   :  { %4128 = vmatpush3.xpose.msk.msra.mxu1 %vm421_vm3, %v499_v62 }
 0x340   :  { %4125 = vmatmul.mubr.msk.f32.vlgmr.msra.gmra.mrb[0].mxu0 %vm421_vm3, %v4961_v63  ;;  %4137 = vmatprep.subr.mxu1 %v4687_v36 }
 0x341   :  { %4134 = vmatprep.mubr.msk.f32.mxu0 %vm4688_vm2, %v4687_v36 }
 0x342   :  { %4130 = vmatmul.mubr.msk.f32.vlgmr.msra.gmra.mrb[8].mxu1 %vm421_vm3, %v4968_v0 }
 0x343   :  { %4139 = vmatprep.mubr.msk.f32.mxu1 %vm4688_vm2, %v4687_v36 }
 0x413   :  { %v493_v1 = vpop.f32.mrb[0].mxu0 }
 0x414   :  { %v4126_v2 = vpop.f32.mrb[1].mxu0  ;;  %v575_v3 = vsel %vm421_vm3, %v493_v1, -inf }
 0x415   :  { %576 = vmax.xlane.f32.xlu0 %v575_v3  ;;  %v571_v4 = vpop.f32.mrb[8].mxu1 }
 0x416   :  { %v4131_v5 = vpop.f32.mrb[9].mxu1  ;;  %v578_v6 = vsel %vm421_vm3, %v571_v4, -inf }
 0x417   :  { %579 = vmax.xlane.f32.xlu1 %v578_v6 }
 0x428   :  { %597 = vrot.lane.b32.xlu1 %v4951_v56, %s4679_s0 }
 0x42b   :  { %673 = vrot.lane.b32.xlu0 %v4953_v59, %s4679_s0 }
 0x42c   :  { %751 = vrot.lane.b32.xlu1 %v4951_v56, %s4689_s13 }
 0x430   :  { %829 = vrot.lane.b32.xlu1 %v4953_v59, %s4689_s13 }
 0x434   :  { %827 = vrot.lane.b32.xlu1 %v4968_v0, %s4690_s24 }
 0x4a2   :  { %v577_v7 = vpop.xlane.xlu0 %576 }
 0x4a3   :  { %v581_v8 = vsub.f32 %v493_v1, %v577_v7 }
 0x4a4   :  { %v580_v9 = vpop.xlane.xlu1 %579 }
 0x4a5   :  { %v583_v10 = vmul.f32 1.442695, %v581_v8  ;;  %v582_v11 = vsub.f32 %v571_v4, %v580_v9 }
 0x4a6   :  { %v674_v12 = vpop.permute.xlu0 %673 }
 0x4a7   :  { %4430 = vpow2.f32 %v583_v10  ;;  %v585_v13 = vmul.f32 1.442695, %v582_v11  ;;  %4138 = vmatpush3.msra.mxu1 %v674_v12 }
 0x4a8   :  { %v598_v14 = vpop.permute.xlu1 %597  ;;  %4147 = vmatprep.subr.mxu1 %v4687_v36 }
 0x4a9   :  { %4432 = vpow2.f32 %v585_v13  ;;  %4133 = vmatpush3.msra.mxu0 %v598_v14 }
 0x4aa   :  { %4142 = vmatprep.subr.mxu0 %v4687_v36 }
 0x4ac   :  { %v752_v21 = vpop.permute.xlu1 %751 }
 0x4b0   :  { %v830_v25 = vpop.permute.xlu1 %829 }
 0x4b1   :  { %v4431_v15 = vpop.eup %4430 }
 0x4b2   :  { %v587_v16 = vsel %vm421_vm3, %v4431_v15, 0.0 }
 0x4b3   :  { %v4433_v17 = vpop.eup %4432  ;;  %588 = vadd.xlane.f32.xlu0 %v587_v16 }
 0x4b4   :  { %v590_v18 = vsel %vm421_vm3, %v4433_v17, 0.0  ;;  %v828_v28 = vpop.permute.xlu1 %827 }
 0x4b7   :  { %591 = vadd.xlane.f32.xlu0 %v590_v18 }
 0x4cd   :  { %749 = vrot.lane.b32.xlu0 %v4961_v63, %s4690_s24 }
 0x540   :  { %v589_v19 = vpop.xlane.xlu0 %588 }
 0x541   :  { %4434 = vrcp.f32 %v589_v19 }
 0x544   :  { %v592_v20 = vpop.xlane.xlu0 %591 }
 0x545   :  { %4436 = vrcp.f32 %v592_v20 }
 0x548   :  { %v750_v27 = vpop.permute.xlu0 %749 }
 0x54b   :  { %v4435_v22 = vpop.eup %4434 }
 0x54c   :  { %v594_v23 = vmul.f32 %v4435_v22, %v4431_v15 }
 0x54e   :  { %4135 = vmatmul.mubr.msk.f32.vlgmr.msra.gmra.mrb[2].mxu0 %vm421_vm3, %v594_v23 }
 0x54f   :  { %v4437_v24 = vpop.eup %4436  ;;  %4143 = vmatpush3.xpose.msk.msra.mxu0 %vm421_vm3, %v752_v21  ;;  %4144 = vmatprep.mubr.msk.f32.mxu0 %vm4688_vm2, %v4687_v36 }
 0x550   :  { %v596_v26 = vmul.f32 %v4437_v24, %v4433_v17  ;;  %4152 = vmatprep.subr.mxu0 %v4687_v36 }
 0x552   :  { %4140 = vmatmul.mubr.msk.f32.vlgmr.msra.gmra.mrb[10].mxu1 %vm421_vm3, %v596_v26  ;;  %4145 = vmatmul.mubr.msk.f32.vlgmr.msra.gmra.mrb[4].mxu0 %vm421_vm3, %v750_v27 }
 0x553   :  { %4148 = vmatpush3.xpose.msk.msra.mxu1 %vm421_vm3, %v830_v25  ;;  %4149 = vmatprep.mubr.msk.f32.mxu1 %vm4688_vm2, %v4687_v36 }
 0x554   :  { %4157 = vmatprep.subr.mxu1 %v4687_v36  ;;  %4154 = vmatprep.mubr.msk.f32.mxu0 %vm4688_vm2, %v4687_v36 }
 0x556   :  { %4150 = vmatmul.mubr.msk.f32.vlgmr.msra.gmra.mrb[12].mxu1 %vm421_vm3, %v828_v28 }
 0x557   :  { %4159 = vmatprep.mubr.msk.f32.mxu1 %vm4688_vm2, %v4687_v36 }
 0x621   :  { %v5011_v29 = vpop.f32.mrb[2].mxu0 }
 0x622   :  { %v4136_v30 = vpop.f32.mrb[3].mxu0 }
 0x625   :  { %v5013_v31 = vpop.f32.mrb[10].mxu1  ;;  %v823_v32 = vpop.f32.mrb[4].mxu0 }
 0x626   :  { %v4141_v33 = vpop.f32.mrb[11].mxu1  ;;  %v4146_v34 = vpop.f32.mrb[5].mxu0  ;;  %v905_v35 = vsel %vm421_vm3, %v823_v32, -inf }
 0x627   :  { %906 = vmax.xlane.f32.xlu0 %v905_v35 }
 0x629   :  { %v901_v37 = vpop.f32.mrb[12].mxu1 }
 0x62a   :  { %v4151_v38 = vpop.f32.mrb[13].mxu1  ;;  %v908_v39 = vsel %vm421_vm3, %v901_v37, -inf }
 0x62b   :  { %909 = vmax.xlane.f32.xlu1 %v908_v39 }
 0x63c   :  { %927 = vrot.lane.b32.xlu1 %v4951_v56, %s4691_s25 }
 0x63d   :  { %1003 = vrot.lane.b32.xlu0 %v4953_v59, %s4691_s25 }
 0x640   :  { %1081 = vrot.lane.b32.xlu1 %v4951_v56, %s4692_s12 }
 0x644   :  { %1159 = vrot.lane.b32.xlu1 %v4953_v59, %s4692_s12 }
 0x648   :  { %1157 = vrot.lane.b32.xlu1 %v4968_v0, %s4693_s23 }
 0x6b4   :  { %v907_v40 = vpop.xlane.xlu0 %906 }
 0x6b5   :  { %v911_v41 = vsub.f32 %v823_v32, %v907_v40 }
 0x6b7   :  { %v913_v42 = vmul.f32 1.442695, %v911_v41 }
 0x6b8   :  { %v1004_v43 = vpop.permute.xlu0 %1003  ;;  %v910_v44 = vpop.xlane.xlu1 %909 }
 0x6b9   :  { %4438 = vpow2.f32 %v913_v42  ;;  %v912_v45 = vsub.f32 %v901_v37, %v910_v44  ;;  %4158 = vmatpush3.msra.mxu1 %v1004_v43 }
 0x6ba   :  { %4167 = vmatprep.subr.mxu1 %v4687_v36 }
 0x6bb   :  { %v915_v46 = vmul.f32 1.442695, %v912_v45 }
 0x6bc   :  { %v928_v47 = vpop.permute.xlu1 %927 }
 0x6bd   :  { %4440 = vpow2.f32 %v915_v46  ;;  %4153 = vmatpush3.msra.mxu0 %v928_v47 }
 0x6be   :  { %4162 = vmatprep.subr.mxu0 %v4687_v36 }
 0x6c0   :  { %v1082_v57 = vpop.permute.xlu1 %1081 }
 0x6c3   :  { %v4439_v48 = vpop.eup %4438 }
 0x6c4   :  { %v917_v49 = vsel %vm421_vm3, %v4439_v48, 0.0  ;;  %v1160_v62 = vpop.permute.xlu1 %1159 }
 0x6c5   :  { %918 = vadd.xlane.f32.xlu0 %v917_v49 }
 0x6c7   :  { %v4441_v50 = vpop.eup %4440 }
 0x6c8   :  { %v920_v53 = vsel %vm421_vm3, %v4441_v50, 0.0  ;;  %v1158_v3 = vpop.permute.xlu1 %1157 }
 0x6c9   :  { %921 = vadd.xlane.f32.xlu0 %v920_v53 }
 0x6df   :  { %1079 = vrot.lane.b32.xlu0 %v4961_v63, %s4693_s23 }
 0x752   :  { %v919_v54 = vpop.xlane.xlu0 %918 }
 0x753   :  { %4442 = vrcp.f32 %v919_v54 }
 0x756   :  { %v922_v55 = vpop.xlane.xlu0 %921 }
 0x757   :  { %4444 = vrcp.f32 %v922_v55 }
 0x75a   :  { %v1080_v2 = vpop.permute.xlu0 %1079 }
 0x75d   :  { %v4443_v58 = vpop.eup %4442 }
 0x75e   :  { %v924_v60 = vmul.f32 %v4443_v58, %v4439_v48 }
 0x760   :  { %4155 = vmatmul.mubr.msk.f32.vlgmr.msra.gmra.mrb[6].mxu0 %vm421_vm3, %v924_v60 }
 0x761   :  { %v4445_v61 = vpop.eup %4444  ;;  %4163 = vmatpush3.xpose.msk.msra.mxu0 %vm421_vm3, %v1082_v57  ;;  %4164 = vmatprep.mubr.msk.f32.mxu0 %vm4688_vm2, %v4687_v36 }
 0x762   :  { %v926_v1 = vmul.f32 %v4445_v61, %v4441_v50  ;;  %4172 = vmatprep.subr.mxu0 %v4687_v36 }
 0x764   :  { %4160 = vmatmul.mubr.msk.f32.vlgmr.msra.gmra.mrb[14].mxu1 %vm421_vm3, %v926_v1  ;;  %4165 = vmatmul.mubr.msk.f32.vlgmr.msra.gmra.mrb[8].mxu0 %vm421_vm3, %v1080_v2 }
 0x765   :  { %4168 = vmatpush3.xpose.msk.msra.mxu1 %vm421_vm3, %v1160_v62  ;;  %4169 = vmatprep.mubr.msk.f32.mxu1 %vm4688_vm2, %v4687_v36 }
 0x766   :  { %4177 = vmatprep.subr.mxu1 %v4687_v36  ;;  %4174 = vmatprep.mubr.msk.f32.mxu0 %vm4688_vm2, %v4687_v36 }
 0x768   :  { %4170 = vmatmul.mubr.msk.f32.vlgmr.msra.gmra.mrb[16].mxu1 %vm421_vm3, %v1158_v3 }
 0x769   :  { %4179 = vmatprep.mubr.msk.f32.mxu1 %vm4688_vm2, %v4687_v36 }
 0x833   :  { %v5049_v4 = vpop.f32.mrb[6].mxu0 }
 0x834   :  { %v4156_v5 = vpop.f32.mrb[7].mxu0 }
 0x837   :  { %v5051_v6 = vpop.f32.mrb[14].mxu1  ;;  %v1153_v7 = vpop.f32.mrb[8].mxu0 }
 0x838   :  { %v4374_v8 = vpack.i.bf16 %v5051_v6, %v5049_v4  ;;  %v4161_v9 = vpop.f32.mrb[15].mxu1  ;;  %v4166_v10 = vpop.f32.mrb[9].mxu0  ;;  %v1235_v11 = vsel %vm421_vm3, %v1153_v7, -inf }
 0x839   :  { %1236 = vmax.xlane.f32.xlu0 %v1235_v11 }
 0x83b   :  { %v1231_v12 = vpop.f32.mrb[16].mxu1 }
 0x83c   :  { %v4171_v13 = vpop.f32.mrb[17].mxu1  ;;  %v1238_v14 = vsel %vm421_vm3, %v1231_v12, -inf }
 0x83d   :  { %1239 = vmax.xlane.f32.xlu1 %v1238_v14 }
 0x84e   :  { %1257 = vrot.lane.b32.xlu1 %v4951_v56, %s4694_s10 }
 0x84f   :  { %1333 = vrot.lane.b32.xlu0 %v4953_v59, %s4694_s10 }
 0x852   :  { %1411 = vrot.lane.b32.xlu1 %v4951_v56, %s4695_s18 }
 0x856   :  { %1489 = vrot.lane.b32.xlu1 %v4953_v59, %s4695_s18 }
 0x85a   :  { %1487 = vrot.lane.b32.xlu1 %v4968_v0, %s4696_s26 }
 0x8c6   :  { %v1237_v15 = vpop.xlane.xlu0 %1236 }
 0x8c7   :  { %v1241_v16 = vsub.f32 %v1153_v7, %v1237_v15 }
 0x8c9   :  { %v1243_v17 = vmul.f32 1.442695, %v1241_v16 }
 0x8ca   :  { %v1334_v18 = vpop.permute.xlu0 %1333  ;;  %v1240_v19 = vpop.xlane.xlu1 %1239 }
 0x8cb   :  { %4446 = vpow2.f32 %v1243_v17  ;;  %v1242_v20 = vsub.f32 %v1231_v12, %v1240_v19  ;;  %4178 = vmatpush3.msra.mxu1 %v1334_v18 }
 0x8cc   :  { %4187 = vmatprep.subr.mxu1 %v4687_v36 }
 0x8cd   :  { %v1245_v21 = vmul.f32 1.442695, %v1242_v20 }
 0x8ce   :  { %v1258_v22 = vpop.permute.xlu1 %1257 }
 0x8cf   :  { %4448 = vpow2.f32 %v1245_v21  ;;  %4173 = vmatpush3.msra.mxu0 %v1258_v22 }
 0x8d0   :  { %4182 = vmatprep.subr.mxu0 %v4687_v36 }
 0x8d2   :  { %v1412_v28 = vpop.permute.xlu1 %1411 }
 0x8d5   :  { %v4447_v23 = vpop.eup %4446 }
 0x8d6   :  { %v1247_v24 = vsel %vm421_vm3, %v4447_v23, 0.0  ;;  %v1490_v34 = vpop.permute.xlu1 %1489 }
 0x8d7   :  { %1248 = vadd.xlane.f32.xlu0 %v1247_v24 }
 0x8d9   :  { %v4449_v0 = vpop.eup %4448 }
 0x8da   :  { %v1250_v25 = vsel %vm421_vm3, %v4449_v0, 0.0  ;;  %v1488_v37 = vpop.permute.xlu1 %1487 }
 0x8db   :  { %1251 = vadd.xlane.f32.xlu0 %v1250_v25 }
 0x8f1   :  { %1409 = vrot.lane.b32.xlu0 %v4961_v63, %s4696_s26 }
 0x964   :  { %v1249_v26 = vpop.xlane.xlu0 %1248 }
 0x965   :  { %4450 = vrcp.f32 %v1249_v26 }
 0x968   :  { %v1252_v27 = vpop.xlane.xlu0 %1251 }
 0x969   :  { %4452 = vrcp.f32 %v1252_v27 }
 0x96c   :  { %v1410_v63 = vpop.permute.xlu0 %1409 }
 0x96f   :  { %v4451_v30 = vpop.eup %4450 }
 0x970   :  { %v1254_v32 = vmul.f32 %v4451_v30, %v4447_v23 }
 0x972   :  { %4175 = vmatmul.mubr.msk.f32.vlgmr.msra.gmra.mrb[10].mxu0 %vm421_vm3, %v1254_v32 }
 0x973   :  { %v4453_v33 = vpop.eup %4452  ;;  %4183 = vmatpush3.xpose.msk.msra.mxu0 %vm421_vm3, %v1412_v28  ;;  %4184 = vmatprep.mubr.msk.f32.mxu0 %vm4688_vm2, %v4687_v36 }
 0x974   :  { %v1256_v35 = vmul.f32 %v4453_v33, %v4449_v0  ;;  %4192 = vmatprep.subr.mxu0 %v4687_v36 }
 0x976   :  { %4180 = vmatmul.mubr.msk.f32.vlgmr.msra.gmra.mrb[18].mxu1 %vm421_vm3, %v1256_v35  ;;  %4185 = vmatmul.mubr.msk.f32.vlgmr.msra.gmra.mrb[12].mxu0 %vm421_vm3, %v1410_v63 }
 0x977   :  { %4188 = vmatpush3.xpose.msk.msra.mxu1 %vm421_vm3, %v1490_v34  ;;  %4189 = vmatprep.mubr.msk.f32.mxu1 %vm4688_vm2, %v4687_v36 }
 0x978   :  { %4197 = vmatprep.subr.mxu1 %v4687_v36  ;;  %4194 = vmatprep.mubr.msk.f32.mxu0 %vm4688_vm2, %v4687_v36 }
 0x97a   :  { %4190 = vmatmul.mubr.msk.f32.vlgmr.msra.gmra.mrb[20].mxu1 %vm421_vm3, %v1488_v37 }
 0x97b   :  { %4199 = vmatprep.mubr.msk.f32.mxu1 %vm4688_vm2, %v4687_v36 }
 0xa45   :  { %v1329_v38 = vpop.f32.mrb[10].mxu0 }
 0xa46   :  { %v4176_v39 = vpop.f32.mrb[11].mxu0 }
 0xa49   :  { %v1405_v40 = vpop.f32.mrb[18].mxu1  ;;  %v1483_v41 = vpop.f32.mrb[12].mxu0 }
 0xa4a   :  { %v4379_v42 = vpack.i.bf16 %v1405_v40, %v1329_v38  ;;  %v4181_v43 = vpop.f32.mrb[19].mxu1  ;;  %v4186_v44 = vpop.f32.mrb[13].mxu0  ;;  %v1565_v45 = vsel %vm421_vm3, %v1483_v41, -inf }
 0xa4b   :  { %1566 = vmax.xlane.f32.xlu0 %v1565_v45 }
 0xa4d   :  { %v1561_v46 = vpop.f32.mrb[20].mxu1 }
 0xa4e   :  { %v4191_v47 = vpop.f32.mrb[21].mxu1  ;;  %v1568_v48 = vsel %vm421_vm3, %v1561_v46, -inf }
 0xa4f   :  { %1569 = vmax.xlane.f32.xlu1 %v1568_v48 }
 0xa60   :  { %1587 = vrot.lane.b32.xlu1 %v4951_v56, %s4697_s8 }
 0xa64   :  { %4375 = vrot.lane.b32.xlu1 %v4374_v8, %s4698_s14  ;;  %v4413_v8 = vld [vmem:[%s5429_s5 + $0x8] sm:$0xff]  }
 0xa68   :  { %4380 = vrot.lane.b32.xlu1 %v4379_v42, %s4673_s28 }
 0xad8   :  { %v1567_v49 = vpop.xlane.xlu0 %1566 }
 0xad9   :  { %v1571_v50 = vsub.f32 %v1483_v41, %v1567_v49  ;;  %v4414_v49 = vld [vmem:[#allocation7] sm:$0xff]  }
 0xadb   :  { %v1573_v53 = vmul.f32 1.442695, %v1571_v50  ;;  %v4416_v50 = vld [vmem:[%s5435_s11] sm:$0xff]  }
 0xadc   :  { %v1570_v54 = vpop.xlane.xlu1 %1569 }
 0xadd   :  { %4454 = vpow2.f32 %v1573_v53  ;;  %v1572_v55 = vsub.f32 %v1561_v46, %v1570_v54  ;;  %v4417_v53 = vld [vmem:[%s5435_s11 + $0x8] sm:$0xff]  }
 0xadf   :  { %v1575_v57 = vmul.f32 1.442695, %v1572_v55 }
 0xae0   :  { %v1588_v58 = vpop.permute.xlu1 %1587 }
 0xae1   :  { %4456 = vpow2.f32 %v1575_v57  ;;  %4193 = vmatpush3.msra.mxu0 %v1588_v58 }
 0xae2   :  { %4202 = vmatprep.subr.bf16.mxu0 %v4687_v36 }
 0xae4   :  { %v4376_v14 = vpop.permute.xlu1 %4375 }
 0xae5   :  { %v4378_v16 = vunpack.i.h.bf16 %v4376_v14  ;;  %v4377_v17 = vunpack.i.l.bf16 %v4376_v14 }
 0xae7   :  { %v4455_v56 = vpop.eup %4454  ;;  %v1764_v21 = vsel %vm421_vm3, %v5013_v31, %v4378_v16  ;;  %v1763_v22 = vsel %vm421_vm3, %v5011_v29, %v4377_v17  ;;  %v3938_v29 = vld [vmem:[%s5430_s6] ss:$0 sm:$0xff] }
 0xae8   :  { %v1577_v60 = vsel %vm421_vm3, %v4455_v56, 0.0  ;;  %v4381_v15 = vpop.permute.xlu1 %4380 }
 0xae9   :  { %1578 = vadd.xlane.f32.xlu0 %v1577_v60  ;;  %v4383_v18 = vunpack.i.h.bf16 %v4381_v15  ;;  %v4382_v19 = vunpack.i.l.bf16 %v4381_v15 }
 0xaeb   :  { %v4457_v61 = vpop.eup %4456  ;;  %v1766_v0 = vsel %vm1765_vm4, %v1763_v22, %v4382_v19  ;;  %v1767_v25 = vsel %vm1765_vm4, %v1764_v21, %v4383_v18  ;;  %v3948_v21 = vld [vmem:[#allocation10] ss:$0 sm:$0xff] }
 0xaec   :  { %v1580_v62 = vsel %vm421_vm3, %v4457_v61, 0.0 }
 0xaed   :  { %1581 = vadd.xlane.f32.xlu0 %v1580_v62  ;;  %v3942_v62 = vld [vmem:[%s5431_s7] ss:$0 sm:$0xff] }
 0xb03   :  { %1663 = vrot.lane.b32.xlu0 %v4953_v59, %s4697_s8  ;;  %v4412_v59 = vld [vmem:[%s5429_s5] sm:$0xff]  }
 0xb76   :  { %v1579_v1 = vpop.xlane.xlu0 %1578 }
 0xb77   :  { %4458 = vrcp.f32 %v1579_v1 }
 0xb7a   :  { %v1582_v2 = vpop.xlane.xlu0 %1581 }
 0xb7b   :  { %4460 = vrcp.f32 %v1582_v2 }
 0xb7e   :  { %v1664_v3 = vpop.permute.xlu0 %1663 }
 0xb7f   :  { %4198 = vmatpush3.msra.mxu1 %v1664_v3 }
 0xb80   :  { %4210 = vmatprep.subr.bf16.mxu1 %v4687_v36 }
 0xb81   :  { %v4459_v4 = vpop.eup %4458 }
 0xb82   :  { %v1584_v5 = vmul.f32 %v4459_v4, %v4455_v56 }
 0xb84   :  { %4195 = vmatmul.mubr.msk.f32.vlgmr.msra.gmra.mrb[14].mxu0 %vm421_vm3, %v1584_v5  ;;  %v3943_v5 = vld [vmem:[#allocation5] ss:$0 sm:$0xff] }
 0xb85   :  { %v4461_v6 = vpop.eup %4460  ;;  %4206 = vmatprep.mubr.msk.bf16.mxu0 %vm4688_vm2, %v4687_v36  ;;  %4203 = vmatpush3.bf16.msra.mxu0 %v4412_v59 }
 0xb86   :  { %v1586_v7 = vmul.f32 %v4461_v6, %v4457_v61  ;;  %4204 = vmatprep.subr.bf16.mxu0 %v4687_v36 }
 0xb88   :  { %4200 = vmatmul.mubr.msk.f32.vlgmr.msra.gmra.mrb[22].mxu1 %vm421_vm3, %v1586_v7 }
 0xb89   :  { %4214 = vmatprep.mubr.msk.bf16.mxu1 %vm4688_vm2, %v4687_v36  ;;  %4205 = vmatpush3.bf16.msra.mxu0 %v4413_v8 }
 0xb8a   :  { %4218 = vmatprep.subr.bf16.mxu0 %v4687_v36  ;;  %4211 = vmatpush3.bf16.msra.mxu1 %v4414_v49  ;;  %v3954_v49 = vld [vmem:[#allocation11] ss:$0 sm:$0xff] }
 0xb8b   :  { %4212 = vmatprep.subr.bf16.mxu1 %v4687_v36 }
 0xc57   :  { %v1659_v9 = vpop.f32.mrb[14].mxu0 }
 0xc58   :  { %v4196_v10 = vpop.f32.mrb[15].mxu0 }
 0xc59   :  { %v4419_v10 = vld [vmem:[%s5435_s11 + $0x18] sm:$0xff]  }
 0xc5b   :  { %v1735_v11 = vpop.f32.mrb[22].mxu1 }
 0xc5c   :  { %v4384_v12 = vpack.i.bf16 %v1735_v11, %v1659_v9  ;;  %v4201_v13 = vpop.f32.mrb[23].mxu1  ;;  %v4418_v9 = vld [vmem:[%s5435_s11 + $0x10] sm:$0xff]  }
 0xc5d   :  { %v3944_v11 = vld [vmem:[#allocation8] ss:$0 sm:$0xff] }
 0xc5e   :  { %4385 = vrot.lane.b32.xlu0 %v4384_v12, %s4699_s19 }
 0xcd0   :  { %v4386_v20 = vpop.permute.xlu0 %4385 }
 0xcd1   :  { %v4388_v23 = vunpack.i.h.bf16 %v4386_v20  ;;  %v4387_v24 = vunpack.i.l.bf16 %v4386_v20 }
 0xcd3   :  { %v1770_v26 = vsel %vm1768_vm5, %v1767_v25, %v4388_v23  ;;  %v1769_v27 = vsel %vm1768_vm5, %v1766_v0, %v4387_v24 }
 0xcd4   :  { %v1771_v28 = vpack.c.bf16 %v1770_v26, %v1769_v27 }
 0xcd6   :  { %4207 = vmatmul.mubr.msk.bf16.vlgmr.msra.gmra.mrb[16].mxu0 %vm182_vm0, %v1771_v28 }
 0xcd7   :  { %4226 = vmatprep.mubr.msk.bf16.mxu0 %vm4688_vm2, %v4687_v36  ;;  %4219 = vmatpush3.bf16.msra.mxu0 %v4416_v50 }
 0xcd8   :  { %4220 = vmatprep.subr.bf16.mxu0 %v4687_v36 }
 0xcdb   :  { %4221 = vmatpush3.bf16.msra.mxu0 %v4417_v53 }
 0xcdc   :  { %4222 = vmatprep.subr.bf16.mxu0 %v4687_v36 }
 0xcdf   :  { %4223 = vmatpush3.bf16.msra.mxu0 %v4418_v9 }
 0xce0   :  { %4224 = vmatprep.subr.bf16.mxu0 %v4687_v36 }
 0xce3   :  { %4225 = vmatpush3.bf16.msra.mxu0 %v4419_v10 }
 0xce4   :  { %4248 = vmatprep.subr.mxu0 %v4687_v36 }
 0xda9   :  { %v1832_v31 = vpop.f32.mrb[16].mxu0 }
 0xdaa   :  { %v1833_v30 = vadd.f32 %v3938_v29, %v1832_v31  ;;  %v4208_v32 = vpop.f32.mrb[17].mxu0 }
 0xdab   :  { %v1835_v33 = vpop.f32.mrb[18].mxu0 }
 0xdac   :  { %v1836_v34 = vadd.f32 %v3938_v29, %v1835_v33  ;;  %v4209_v35 = vpop.f32.mrb[19].mxu0  ;;  %v1839_v63 = vadd.f32 %v1833_v30, %v4939_v51 }
 0xdae   :  { %v1841_v37 = vsel %vm182_vm0, %v1839_v63, 0.0  ;;  %v1840_v38 = vadd.f32 %v1836_v34, %v4941_v52  ;;  %v4415_v52 = vld [vmem:[#allocation7 + $0x8] sm:$0xff]  }
 0xdaf   :  { %1842 = vadd.xlane.f32.xlu1 %v1841_v37  ;;  %4213 = vmatpush3.bf16.msra.mxu1 %v4415_v52 }
 0xdb0   :  { %v1844_v39 = vsel %vm182_vm0, %v1840_v38, 0.0  ;;  %4230 = vmatprep.subr.bf16.mxu1 %v4687_v36 }
 0xdb1   :  { %1845 = vadd.xlane.f32.xlu0 %v1844_v39 }
 0xe3c   :  { %v1843_v40 = vpop.xlane.xlu1 %1842 }
 0xe3d   :  { %v1848_v41 = vmul.f32 0.03125, %v1843_v40 }
 0xe3e   :  { %v1846_v42 = vpop.xlane.xlu0 %1845 }
 0xe3f   :  { %v1850_v43 = vsub.f32 %v1839_v63, %v1848_v41  ;;  %v1849_v44 = vmul.f32 0.03125, %v1846_v42  ;;  %v4420_v41 = vld [vmem:[%s5427_s3 + $0x10] sm:$0xff]   ;;  %v4421_v42 = vld [vmem:[%s5427_s3 + $0x18] sm:$0xff]  }
 0xe41   :  { %v1851_v45 = vsub.f32 %v1840_v38, %v1849_v44  ;;  %v1852_v46 = vmul.f32 %v1850_v43, %v1850_v43 }
 0xe43   :  { %v1854_v47 = vsel %vm182_vm0, %v1852_v46, 0.0  ;;  %v1853_v48 = vmul.f32 %v1851_v45, %v1851_v45 }
 0xe44   :  { %1855 = vadd.xlane.f32.xlu0 %v1854_v47 }
 0xe45   :  { %v1857_v51 = vsel %vm182_vm0, %v1853_v48, 0.0 }
 0xe46   :  { %1858 = vadd.xlane.f32.xlu1 %v1857_v51 }
 0xed1   :  { %v1856_v54 = vpop.xlane.xlu0 %1855 }
 0xed2   :  { %v1860_v55 = vmul.f32 0.03125, %v1856_v54 }
 0xed3   :  { %v1859_v57 = vpop.xlane.xlu1 %1858 }
 0xed4   :  { %v1862_v58 = vadd.f32 1e-05, %v1860_v55  ;;  %v1861_v56 = vmul.f32 0.03125, %v1859_v57  ;;  %v3955_v55 = vld [vmem:[#allocation13] ss:$0 sm:$0xff] }
 0xed6   :  { %4462 = vrsqrt.f32 %v1862_v58  ;;  %v1863_v60 = vadd.f32 1e-05, %v1861_v56 }
 0xed8   :  { %4464 = vrsqrt.f32 %v1863_v60 }
 0xee0   :  { %v4463_v61 = vpop.eup %4462 }
 0xee1   :  { %v1866_v1 = vmul.f32 %v4463_v61, %v1850_v43  ;;  %v3961_v61 = vld [vmem:[%s5428_s4 + $0x1] ss:$0 sm:$0xff] }
 0xee2   :  { %v4465_v2 = vpop.eup %4464 }
 0xee3   :  { %v1875_v3 = vmul.f32 %v3942_v62, %v1866_v1  ;;  %v1867_v4 = vmul.f32 %v4465_v2, %v1851_v45 }
 0xee5   :  { %v1876_v6 = vmul.f32 %v3942_v62, %v1867_v4  ;;  %v1884_v7 = vadd.f32 %v3943_v5, %v1875_v3 }
 0xee7   :  { %v1885_v59 = vadd.f32 %v3943_v5, %v1876_v6 }
 0xee9   :  { %v1886_v8 = vpack.c.bf16 %v1885_v59, %v1884_v7 }
 0xeeb   :  { %4215 = vmatmul.mubr.msk.bf16.vlgmr.msra.gmra.mrb[24].mxu1 %vm182_vm0, %v1886_v8 }
 0xeec   :  { %4234 = vmatprep.mubr.msk.bf16.mxu1 %vm4688_vm2, %v4687_v36  ;;  %4231 = vmatpush3.bf16.msra.mxu1 %v4420_v41 }
 0xeed   :  { %4232 = vmatprep.subr.bf16.mxu1 %v4687_v36 }
 0xef0   :  { %4233 = vmatpush3.bf16.msra.mxu1 %v4421_v42 }
 0xef1   :  { %4238 = vmatprep.subr.mxu1 %v4687_v36 }
 0xfbe   :  { %v1947_v12 = vpop.f32.mrb[24].mxu1 }
 0xfbf   :  { %v1948_v13 = vadd.f32 %v3944_v11, %v1947_v12  ;;  %v4216_v14 = vpop.f32.mrb[25].mxu1 }
 0xfc0   :  { %v1950_v15 = vpop.f32.mrb[26].mxu1 }
 0xfc1   :  { %v1951_v16 = vadd.f32 %v3944_v11, %v1950_v15  ;;  %v4217_v17 = vpop.f32.mrb[27].mxu1  ;;  %v1954_v18 = vmax.f32 %v1948_v13, 0.0 }
 0xfc3   :  { %v1955_v19 = vmax.f32 %v1951_v16, 0.0 }
 0xfc5   :  { %v1956_v20 = vpack.c.bf16 %v1955_v19, %v1954_v18 }
 0xfc7   :  { %4227 = vmatmul.mubr.msk.bf16.vlgmr.msra.gmra.mrb[20].mxu0 %vm1996_vm6, %v1956_v20 }
 0xfc8   :  { %4250 = vmatprep.mubr.msk.f32.mxu0 %vm4688_vm2, %v4687_v36 }
0x109a   :  { %v2034_v22 = vpop.f32.mrb[20].mxu0 }
0x109b   :  { %v2035_v23 = vadd.f32 %v3948_v21, %v2034_v22  ;;  %v4228_v24 = vpop.f32.mrb[21].mxu0 }
0x109c   :  { %v2037_v0 = vpop.f32.mrb[22].mxu0 }
0x109d   :  { %v2038_v25 = vadd.f32 %v3948_v21, %v2037_v0  ;;  %v4229_v26 = vpop.f32.mrb[23].mxu0  ;;  %v2041_v27 = vadd.f32 %v2035_v23, %v1884_v7 }
0x109f   :  { %v2043_v28 = vsel %vm182_vm0, %v2041_v27, 0.0  ;;  %v2042_v29 = vadd.f32 %v2038_v25, %v1885_v59 }
0x10a0   :  { %2044 = vadd.xlane.f32.xlu0 %v2043_v28 }
0x10a1   :  { %v2046_v31 = vsel %vm182_vm0, %v2042_v29, 0.0 }
0x10a2   :  { %2047 = vadd.xlane.f32.xlu1 %v2046_v31 }
0x112d   :  { %v2045_v30 = vpop.xlane.xlu0 %2044 }
0x112e   :  { %v2049_v32 = vmul.f32 0.03125, %v2045_v30 }
0x112f   :  { %v2048_v33 = vpop.xlane.xlu1 %2047 }
0x1130   :  { %v2051_v34 = vsub.f32 %v2041_v27, %v2049_v32  ;;  %v2050_v35 = vmul.f32 0.03125, %v2048_v33 }
0x1132   :  { %v2052_v63 = vsub.f32 %v2042_v29, %v2050_v35  ;;  %v2053_v37 = vmul.f32 %v2051_v34, %v2051_v34 }
0x1134   :  { %v2055_v38 = vsel %vm182_vm0, %v2053_v37, 0.0  ;;  %v2054_v39 = vmul.f32 %v2052_v63, %v2052_v63 }
0x1135   :  { %2056 = vadd.xlane.f32.xlu0 %v2055_v38 }
0x1136   :  { %v2058_v40 = vsel %vm182_vm0, %v2054_v39, 0.0 }
0x1137   :  { %2059 = vadd.xlane.f32.xlu1 %v2058_v40 }
0x11c2   :  { %v2057_v43 = vpop.xlane.xlu0 %2056 }
0x11c3   :  { %v2061_v44 = vmul.f32 0.03125, %v2057_v43 }
0x11c4   :  { %v2060_v45 = vpop.xlane.xlu1 %2059 }
0x11c5   :  { %v2063_v46 = vadd.f32 1e-05, %v2061_v44  ;;  %v2062_v47 = vmul.f32 0.03125, %v2060_v45 }
0x11c7   :  { %4466 = vrsqrt.f32 %v2063_v46  ;;  %v2064_v48 = vadd.f32 1e-05, %v2062_v47 }
0x11c9   :  { %4468 = vrsqrt.f32 %v2064_v48 }
0x11d1   :  { %v4467_v51 = vpop.eup %4466 }
0x11d2   :  { %v2067_v52 = vmul.f32 %v4467_v51, %v2051_v34 }
0x11d3   :  { %v4469_v50 = vpop.eup %4468 }
0x11d4   :  { %v2076_v53 = vmul.f32 %v3954_v49, %v2067_v52  ;;  %v2068_v54 = vmul.f32 %v4469_v50, %v2052_v63 }
0x11d6   :  { %v2077_v57 = vmul.f32 %v3954_v49, %v2068_v54  ;;  %v5178_v58 = vadd.f32 %v3955_v55, %v2076_v53 }
0x11d8   :  { %v5180_v56 = vadd.f32 %v3955_v55, %v2077_v57 }
0x11da   :  { %v2087_v60 = vpack.c.bf16 %v5180_v56, %v5178_v58 }
0x11dc   :  { %4235 = vmatmul.mubr.msk.bf16.vlgmr.msra.gmra.mrb[28].mxu1 %vm182_vm0, %v2087_v60 }
0x11dd   :  { %4240 = vmatprep.mubr.msk.f32.mxu1 %vm4688_vm2, %v4687_v36 }
0x12af   :  { %v2150_v62 = vpop.f32.mrb[28].mxu1 }
0x12b0   :  { %v5190_v1 = vadd.f32 %v3961_v61, %v2150_v62  ;;  %v4236_v2 = vpop.f32.mrb[29].mxu1 }
0x12b1   :  { %v2153_v3 = vpop.f32.mrb[30].mxu1 }
0x12b2   :  { %v5192_v4 = vadd.f32 %v3961_v61, %v2153_v3  ;;  %2160 = vrot.lane.b32.xlu0 %v5190_v1, %s4685_s1  ;;  %v4237_v5 = vpop.f32.mrb[31].mxu1  ;;  %v5200_v7 = vmul.f32 0.35355338, %v5190_v1 }
0x12b4   :  { %2238 = vrot.lane.b32.xlu1 %v5192_v4, %s4685_s1  ;;  %v5209_v8 = vmul.f32 0.35355338, %v5192_v4 }
0x1324   :  { %v2161_v6 = vpop.permute.xlu0 %2160 }
0x1325   :  { %4239 = vmatpush3.xpose.msk.msra.mxu1 %vm421_vm3, %v2161_v6 }
0x1326   :  { %4243 = vmatprep.subr.mxu1 %v4687_v36  ;;  %v2239_v59 = vpop.permute.xlu1 %2238 }
0x1328   :  { %4241 = vmatmul.mubr.msk.f32.vlgmr.msra.gmra.mrb[32].mxu1 %vm421_vm3, %v5200_v7 }
0x1329   :  { %4244 = vmatpush3.xpose.msk.msra.mxu1 %vm421_vm3, %v2239_v59  ;;  %4245 = vmatprep.mubr.msk.f32.mxu1 %vm4688_vm2, %v4687_v36 }
0x132a   :  { %4253 = vmatprep.subr.mxu1 %v4687_v36 }
0x132c   :  { %4246 = vmatmul.mubr.msk.f32.vlgmr.msra.gmra.mrb[34].mxu1 %vm421_vm3, %v5209_v8 }
0x132d   :  { %4255 = vmatprep.mubr.msk.f32.mxu1 %vm4688_vm2, %v4687_v36 }
0x13fb   :  { %v2233_v9 = vpop.f32.mrb[32].mxu1 }
0x13fc   :  { %v4242_v10 = vpop.f32.mrb[33].mxu1  ;;  %v2315_v11 = vsel %vm421_vm3, %v2233_v9, -inf }
0x13fd   :  { %2316 = vmax.xlane.f32.xlu1 %v2315_v11 }
0x13ff   :  { %v2311_v12 = vpop.f32.mrb[34].mxu1 }
0x1400   :  { %v4247_v13 = vpop.f32.mrb[35].mxu1  ;;  %v2318_v14 = vsel %vm421_vm3, %v2311_v12, -inf }
0x1401   :  { %2319 = vmax.xlane.f32.xlu0 %v2318_v14 }
0x140e   :  { %2413 = vrot.lane.b32.xlu1 %v5192_v4, %s4679_s0 }
0x1412   :  { %2491 = vrot.lane.b32.xlu1 %v5190_v1, %s4689_s13 }
0x1417   :  { %2337 = vrot.lane.b32.xlu0 %v5190_v1, %s4679_s0 }
0x141b   :  { %2569 = vrot.lane.b32.xlu0 %v5192_v4, %s4689_s13 }
0x148a   :  { %v2317_v15 = vpop.xlane.xlu1 %2316 }
0x148b   :  { %v2321_v16 = vsub.f32 %v2233_v9, %v2317_v15 }
0x148d   :  { %v2323_v17 = vmul.f32 1.442695, %v2321_v16 }
0x148e   :  { %v2414_v18 = vpop.permute.xlu1 %2413  ;;  %v2320_v19 = vpop.xlane.xlu0 %2319 }
0x148f   :  { %4470 = vpow2.f32 %v2323_v17  ;;  %v2322_v20 = vsub.f32 %v2311_v12, %v2320_v19  ;;  %4254 = vmatpush3.msra.mxu1 %v2414_v18 }
0x1490   :  { %4263 = vmatprep.subr.mxu1 %v4687_v36 }
0x1491   :  { %v2325_v21 = vmul.f32 1.442695, %v2322_v20 }
0x1492   :  { %v2338_v22 = vpop.permute.xlu0 %2337  ;;  %v2492_v27 = vpop.permute.xlu1 %2491 }
0x1493   :  { %4472 = vpow2.f32 %v2325_v21  ;;  %4249 = vmatpush3.msra.mxu0 %v2338_v22 }
0x1494   :  { %4258 = vmatprep.subr.mxu0 %v4687_v36 }
0x1496   :  { %v2570_v26 = vpop.permute.xlu0 %2569 }
0x1499   :  { %v4471_v23 = vpop.eup %4470 }
0x149a   :  { %v2327_v24 = vsel %vm421_vm3, %v4471_v23, 0.0 }
0x149b   :  { %2328 = vadd.xlane.f32.xlu0 %v2327_v24 }
0x149d   :  { %v4473_v0 = vpop.eup %4472 }
0x149e   :  { %v2330_v25 = vsel %vm421_vm3, %v4473_v0, 0.0 }
0x149f   :  { %2331 = vadd.xlane.f32.xlu1 %v2330_v25 }
0x14b0   :  { %2489 = vrot.lane.b32.xlu1 %v5200_v7, %s4690_s24 }
0x14b1   :  { %2567 = vrot.lane.b32.xlu0 %v5209_v8, %s4690_s24 }
0x1528   :  { %v2329_v28 = vpop.xlane.xlu0 %2328 }
0x1529   :  { %4474 = vrcp.f32 %v2329_v28 }
0x152c   :  { %v2332_v29 = vpop.xlane.xlu1 %2331  ;;  %v2568_v35 = vpop.permute.xlu0 %2567 }
0x152d   :  { %4476 = vrcp.f32 %v2332_v29 }
0x1530   :  { %v2490_v34 = vpop.permute.xlu1 %2489 }
0x1533   :  { %v4475_v31 = vpop.eup %4474 }
0x1534   :  { %v2334_v30 = vmul.f32 %v4475_v31, %v4471_v23 }
0x1536   :  { %4251 = vmatmul.mubr.msk.f32.vlgmr.msra.gmra.mrb[24].mxu0 %vm421_vm3, %v2334_v30 }
0x1537   :  { %v4477_v32 = vpop.eup %4476  ;;  %4259 = vmatpush3.xpose.msk.msra.mxu0 %vm421_vm3, %v2492_v27  ;;  %4260 = vmatprep.mubr.msk.f32.mxu0 %vm4688_vm2, %v4687_v36 }
0x1538   :  { %v2336_v33 = vmul.f32 %v4477_v32, %v4473_v0  ;;  %4268 = vmatprep.subr.mxu0 %v4687_v36 }
0x153a   :  { %4256 = vmatmul.mubr.msk.f32.vlgmr.msra.gmra.mrb[36].mxu1 %vm421_vm3, %v2336_v33  ;;  %4261 = vmatmul.mubr.msk.f32.vlgmr.msra.gmra.mrb[26].mxu0 %vm421_vm3, %v2490_v34 }
0x153b   :  { %4264 = vmatpush3.xpose.msk.msra.mxu1 %vm421_vm3, %v2570_v26  ;;  %4265 = vmatprep.mubr.msk.f32.mxu1 %vm4688_vm2, %v4687_v36 }
0x153c   :  { %4273 = vmatprep.subr.mxu1 %v4687_v36  ;;  %4270 = vmatprep.mubr.msk.f32.mxu0 %vm4688_vm2, %v4687_v36 }
0x153e   :  { %4266 = vmatmul.mubr.msk.f32.vlgmr.msra.gmra.mrb[38].mxu1 %vm421_vm3, %v2568_v35 }
0x153f   :  { %4275 = vmatprep.mubr.msk.f32.mxu1 %vm4688_vm2, %v4687_v36 }
0x1609   :  { %v5250_v63 = vpop.f32.mrb[24].mxu0 }
0x160a   :  { %v4252_v37 = vpop.f32.mrb[25].mxu0 }
0x160d   :  { %v5252_v38 = vpop.f32.mrb[36].mxu1  ;;  %v2563_v39 = vpop.f32.mrb[26].mxu0 }
0x160e   :  { %v4257_v40 = vpop.f32.mrb[37].mxu1  ;;  %v4262_v41 = vpop.f32.mrb[27].mxu0  ;;  %v2645_v42 = vsel %vm421_vm3, %v2563_v39, -inf }
0x160f   :  { %2646 = vmax.xlane.f32.xlu1 %v2645_v42 }
0x1611   :  { %v2641_v43 = vpop.f32.mrb[38].mxu1 }
0x1612   :  { %v4267_v44 = vpop.f32.mrb[39].mxu1  ;;  %v2648_v45 = vsel %vm421_vm3, %v2641_v43, -inf }
0x1613   :  { %2649 = vmax.xlane.f32.xlu0 %v2648_v45 }
0x1620   :  { %2743 = vrot.lane.b32.xlu1 %v5192_v4, %s4691_s25 }
0x1624   :  { %2821 = vrot.lane.b32.xlu1 %v5190_v1, %s4692_s12 }
0x1629   :  { %2667 = vrot.lane.b32.xlu0 %v5190_v1, %s4691_s25 }
0x162d   :  { %2899 = vrot.lane.b32.xlu0 %v5192_v4, %s4692_s12 }
0x169c   :  { %v2647_v46 = vpop.xlane.xlu1 %2646 }
0x169d   :  { %v2651_v47 = vsub.f32 %v2563_v39, %v2647_v46 }
0x169f   :  { %v2653_v48 = vmul.f32 1.442695, %v2651_v47 }
0x16a0   :  { %v2744_v51 = vpop.permute.xlu1 %2743  ;;  %v2650_v49 = vpop.xlane.xlu0 %2649 }
0x16a1   :  { %4478 = vpow2.f32 %v2653_v48  ;;  %v2652_v52 = vsub.f32 %v2641_v43, %v2650_v49  ;;  %4274 = vmatpush3.msra.mxu1 %v2744_v51 }
0x16a2   :  { %4283 = vmatprep.subr.mxu1 %v4687_v36 }
0x16a3   :  { %v2655_v50 = vmul.f32 1.442695, %v2652_v52 }
0x16a4   :  { %v2668_v53 = vpop.permute.xlu0 %2667  ;;  %v2822_v62 = vpop.permute.xlu1 %2821 }
0x16a5   :  { %4480 = vpow2.f32 %v2655_v50  ;;  %4269 = vmatpush3.msra.mxu0 %v2668_v53 }
0x16a6   :  { %4278 = vmatprep.subr.mxu0 %v4687_v36 }
0x16a8   :  { %v2900_v61 = vpop.permute.xlu0 %2899 }
0x16ab   :  { %v4479_v54 = vpop.eup %4478 }
0x16ac   :  { %v2657_v55 = vsel %vm421_vm3, %v4479_v54, 0.0 }
0x16ad   :  { %2658 = vadd.xlane.f32.xlu0 %v2657_v55 }
0x16af   :  { %v4481_v57 = vpop.eup %4480 }
0x16b0   :  { %v2660_v60 = vsel %vm421_vm3, %v4481_v57, 0.0 }
0x16b1   :  { %2661 = vadd.xlane.f32.xlu1 %v2660_v60 }
0x16c2   :  { %2819 = vrot.lane.b32.xlu1 %v5200_v7, %s4693_s23 }
0x16c3   :  { %2897 = vrot.lane.b32.xlu0 %v5209_v8, %s4693_s23 }
0x173a   :  { %v2659_v2 = vpop.xlane.xlu0 %2658 }
0x173b   :  { %4482 = vrcp.f32 %v2659_v2 }
0x173e   :  { %v2662_v3 = vpop.xlane.xlu1 %2661  ;;  %v2898_v11 = vpop.permute.xlu0 %2897 }
0x173f   :  { %4484 = vrcp.f32 %v2662_v3 }
0x1742   :  { %v2820_v10 = vpop.permute.xlu1 %2819 }
0x1745   :  { %v4483_v5 = vpop.eup %4482 }
0x1746   :  { %v2664_v6 = vmul.f32 %v4483_v5, %v4479_v54 }
0x1748   :  { %4271 = vmatmul.mubr.msk.f32.vlgmr.msra.gmra.mrb[28].mxu0 %vm421_vm3, %v2664_v6 }
0x1749   :  { %v4485_v59 = vpop.eup %4484  ;;  %4279 = vmatpush3.xpose.msk.msra.mxu0 %vm421_vm3, %v2822_v62  ;;  %4280 = vmatprep.mubr.msk.f32.mxu0 %vm4688_vm2, %v4687_v36 }
0x174a   :  { %v2666_v9 = vmul.f32 %v4485_v59, %v4481_v57  ;;  %4288 = vmatprep.subr.mxu0 %v4687_v36 }
0x174c   :  { %4276 = vmatmul.mubr.msk.f32.vlgmr.msra.gmra.mrb[40].mxu1 %vm421_vm3, %v2666_v9  ;;  %4281 = vmatmul.mubr.msk.f32.vlgmr.msra.gmra.mrb[30].mxu0 %vm421_vm3, %v2820_v10 }
0x174d   :  { %4284 = vmatpush3.xpose.msk.msra.mxu1 %vm421_vm3, %v2900_v61  ;;  %4285 = vmatprep.mubr.msk.f32.mxu1 %vm4688_vm2, %v4687_v36 }
0x174e   :  { %4293 = vmatprep.subr.mxu1 %v4687_v36  ;;  %4290 = vmatprep.mubr.msk.f32.mxu0 %vm4688_vm2, %v4687_v36 }
0x1750   :  { %4286 = vmatmul.mubr.msk.f32.vlgmr.msra.gmra.mrb[42].mxu1 %vm421_vm3, %v2898_v11 }
0x1751   :  { %4295 = vmatprep.mubr.msk.f32.mxu1 %vm4688_vm2, %v4687_v36 }
0x181b   :  { %v5288_v12 = vpop.f32.mrb[28].mxu0 }
0x181c   :  { %v4272_v13 = vpop.f32.mrb[29].mxu0 }
0x181f   :  { %v5290_v14 = vpop.f32.mrb[40].mxu1  ;;  %v2893_v15 = vpop.f32.mrb[30].mxu0 }
0x1820   :  { %v4389_v16 = vpack.i.bf16 %v5290_v14, %v5288_v12  ;;  %v4277_v17 = vpop.f32.mrb[41].mxu1  ;;  %v4282_v18 = vpop.f32.mrb[31].mxu0  ;;  %v2975_v19 = vsel %vm421_vm3, %v2893_v15, -inf }
0x1821   :  { %2976 = vmax.xlane.f32.xlu1 %v2975_v19 }
0x1823   :  { %v2971_v20 = vpop.f32.mrb[42].mxu1 }
0x1824   :  { %v4287_v21 = vpop.f32.mrb[43].mxu1  ;;  %v2978_v22 = vsel %vm421_vm3, %v2971_v20, -inf }
0x1825   :  { %2979 = vmax.xlane.f32.xlu0 %v2978_v22 }
0x1832   :  { %3073 = vrot.lane.b32.xlu1 %v5192_v4, %s4694_s10 }
0x1836   :  { %3151 = vrot.lane.b32.xlu1 %v5190_v1, %s4695_s18 }
0x183b   :  { %2997 = vrot.lane.b32.xlu0 %v5190_v1, %s4694_s10 }
0x183f   :  { %3229 = vrot.lane.b32.xlu0 %v5192_v4, %s4695_s18 }
0x18ae   :  { %v2977_v23 = vpop.xlane.xlu1 %2976 }
0x18af   :  { %v2981_v24 = vsub.f32 %v2893_v15, %v2977_v23  ;;  %v4422_v15 = vld [vmem:[%s5429_s5 + $0x10] sm:$0xff]  }
0x18b1   :  { %v2983_v0 = vmul.f32 1.442695, %v2981_v24 }
0x18b2   :  { %v3074_v25 = vpop.permute.xlu1 %3073  ;;  %v2980_v26 = vpop.xlane.xlu0 %2979 }
0x18b3   :  { %4486 = vpow2.f32 %v2983_v0  ;;  %v2982_v27 = vsub.f32 %v2971_v20, %v2980_v26  ;;  %4294 = vmatpush3.msra.mxu1 %v3074_v25 }
0x18b4   :  { %4303 = vmatprep.subr.mxu1 %v4687_v36 }
0x18b5   :  { %v2985_v28 = vmul.f32 1.442695, %v2982_v27 }
0x18b6   :  { %v2998_v29 = vpop.permute.xlu0 %2997  ;;  %v3152_v35 = vpop.permute.xlu1 %3151 }
0x18b7   :  { %4488 = vpow2.f32 %v2985_v28  ;;  %4289 = vmatpush3.msra.mxu0 %v2998_v29 }
0x18b8   :  { %4298 = vmatprep.subr.mxu0 %v4687_v36 }
0x18ba   :  { %v3230_v34 = vpop.permute.xlu0 %3229 }
0x18bd   :  { %v4487_v31 = vpop.eup %4486 }
0x18be   :  { %v2987_v30 = vsel %vm421_vm3, %v4487_v31, 0.0 }
0x18bf   :  { %2988 = vadd.xlane.f32.xlu0 %v2987_v30 }
0x18c1   :  { %v4489_v32 = vpop.eup %4488 }
0x18c2   :  { %v2990_v33 = vsel %vm421_vm3, %v4489_v32, 0.0 }
0x18c3   :  { %2991 = vadd.xlane.f32.xlu1 %v2990_v33 }
0x18d4   :  { %3149 = vrot.lane.b32.xlu1 %v5200_v7, %s4696_s26 }
0x18d5   :  { %3227 = vrot.lane.b32.xlu0 %v5209_v8, %s4696_s26 }
0x194c   :  { %v2989_v37 = vpop.xlane.xlu0 %2988 }
0x194d   :  { %4490 = vrcp.f32 %v2989_v37 }
0x1950   :  { %v2992_v39 = vpop.xlane.xlu1 %2991  ;;  %v3228_v43 = vpop.permute.xlu0 %3227 }
0x1951   :  { %4492 = vrcp.f32 %v2992_v39 }
0x1954   :  { %v3150_v8 = vpop.permute.xlu1 %3149 }
0x1957   :  { %v4491_v40 = vpop.eup %4490 }
0x1958   :  { %v2994_v41 = vmul.f32 %v4491_v40, %v4487_v31 }
0x195a   :  { %4291 = vmatmul.mubr.msk.f32.vlgmr.msra.gmra.mrb[32].mxu0 %vm421_vm3, %v2994_v41 }
0x195b   :  { %v4493_v42 = vpop.eup %4492  ;;  %4299 = vmatpush3.xpose.msk.msra.mxu0 %vm421_vm3, %v3152_v35  ;;  %4300 = vmatprep.mubr.msk.f32.mxu0 %vm4688_vm2, %v4687_v36 }
0x195c   :  { %v2996_v7 = vmul.f32 %v4493_v42, %v4489_v32  ;;  %4308 = vmatprep.subr.mxu0 %v4687_v36 }
0x195e   :  { %4296 = vmatmul.mubr.msk.f32.vlgmr.msra.gmra.mrb[44].mxu1 %vm421_vm3, %v2996_v7  ;;  %4301 = vmatmul.mubr.msk.f32.vlgmr.msra.gmra.mrb[34].mxu0 %vm421_vm3, %v3150_v8 }
0x195f   :  { %4304 = vmatpush3.xpose.msk.msra.mxu1 %vm421_vm3, %v3230_v34  ;;  %4305 = vmatprep.mubr.msk.f32.mxu1 %vm4688_vm2, %v4687_v36 }
0x1960   :  { %4313 = vmatprep.subr.mxu1 %v4687_v36  ;;  %4310 = vmatprep.mubr.msk.f32.mxu0 %vm4688_vm2, %v4687_v36 }
0x1962   :  { %4306 = vmatmul.mubr.msk.f32.vlgmr.msra.gmra.mrb[46].mxu1 %vm421_vm3, %v3228_v43 }
0x1963   :  { %4315 = vmatprep.mubr.msk.f32.mxu1 %vm4688_vm2, %v4687_v36 }
0x1a2d   :  { %v3069_v44 = vpop.f32.mrb[32].mxu0 }
0x1a2e   :  { %v4292_v45 = vpop.f32.mrb[33].mxu0 }
0x1a31   :  { %v3145_v46 = vpop.f32.mrb[44].mxu1  ;;  %v3223_v47 = vpop.f32.mrb[34].mxu0 }
0x1a32   :  { %v4394_v48 = vpack.i.bf16 %v3145_v46, %v3069_v44  ;;  %v4297_v51 = vpop.f32.mrb[45].mxu1  ;;  %v4302_v49 = vpop.f32.mrb[35].mxu0  ;;  %v3305_v52 = vsel %vm421_vm3, %v3223_v47, -inf }
0x1a33   :  { %3306 = vmax.xlane.f32.xlu1 %v3305_v52 }
0x1a35   :  { %v3301_v50 = vpop.f32.mrb[46].mxu1 }
0x1a36   :  { %v4307_v53 = vpop.f32.mrb[47].mxu1  ;;  %v3308_v54 = vsel %vm421_vm3, %v3301_v50, -inf }
0x1a37   :  { %3309 = vmax.xlane.f32.xlu0 %v3308_v54 }
0x1ac0   :  { %v3307_v55 = vpop.xlane.xlu1 %3306 }
0x1ac1   :  { %v3311_v57 = vsub.f32 %v3223_v47, %v3307_v55  ;;  %v4425_v55 = vld [vmem:[#allocation7 + $0x18] sm:$0xff]  }
0x1ac3   :  { %v3313_v60 = vmul.f32 1.442695, %v3311_v57  ;;  %v4426_v57 = vld [vmem:[%s5435_s11 + $0x20] sm:$0xff]  }
0x1ac4   :  { %v3310_v61 = vpop.xlane.xlu0 %3309 }
0x1ac5   :  { %4494 = vpow2.f32 %v3313_v60  ;;  %v3312_v62 = vsub.f32 %v3301_v50, %v3310_v61  ;;  %v4427_v60 = vld [vmem:[%s5435_s11 + $0x28] sm:$0xff]  }
0x1ac7   :  { %v3315_v2 = vmul.f32 1.442695, %v3312_v62 }
0x1ac9   :  { %4496 = vpow2.f32 %v3315_v2 }
0x1acf   :  { %v4495_v3 = vpop.eup %4494 }
0x1ad0   :  { %v3317_v5 = vsel %vm421_vm3, %v4495_v3, 0.0 }
0x1ad1   :  { %3318 = vadd.xlane.f32.xlu0 %v3317_v5 }
0x1ad3   :  { %v4497_v6 = vpop.eup %4496 }
0x1ad4   :  { %v3320_v59 = vsel %vm421_vm3, %v4497_v6, 0.0 }
0x1ad5   :  { %3321 = vadd.xlane.f32.xlu1 %v3320_v59 }
0x1ae6   :  { %3403 = vrot.lane.b32.xlu1 %v5192_v4, %s4697_s8 }
0x1ae7   :  { %3327 = vrot.lane.b32.xlu0 %v5190_v1, %s4697_s8 }
0x1aea   :  { %4390 = vrot.lane.b32.xlu1 %v4389_v16, %s4698_s14  ;;  %v4423_v16 = vld [vmem:[%s5429_s5 + $0x18] sm:$0xff]  }
0x1aeb   :  { %4395 = vrot.lane.b32.xlu0 %v4394_v48, %s4673_s28 }
0x1b5e   :  { %v3319_v9 = vpop.xlane.xlu0 %3318 }
0x1b5f   :  { %4498 = vrcp.f32 %v3319_v9 }
0x1b62   :  { %v3322_v10 = vpop.xlane.xlu1 %3321  ;;  %v3328_v11 = vpop.permute.xlu0 %3327 }
0x1b63   :  { %4500 = vrcp.f32 %v3322_v10  ;;  %4309 = vmatpush3.msra.mxu0 %v3328_v11  ;;  %v3999_v10 = vld [vmem:[%s5431_s7 + $0x1] ss:$0 sm:$0xff] }
0x1b64   :  { %4318 = vmatprep.subr.bf16.mxu0 %v4687_v36 }
0x1b66   :  { %v3404_v13 = vpop.permute.xlu1 %3403  ;;  %v4396_v0 = vpop.permute.xlu0 %4395 }
0x1b67   :  { %4314 = vmatpush3.msra.mxu1 %v3404_v13  ;;  %v4398_v27 = vunpack.i.h.bf16 %v4396_v0  ;;  %v4397_v28 = vunpack.i.l.bf16 %v4396_v0 }
0x1b68   :  { %4326 = vmatprep.subr.bf16.mxu1 %v4687_v36 }
0x1b69   :  { %v4499_v1 = vpop.eup %4498 }
0x1b6a   :  { %v3324_v4 = vmul.f32 %v4499_v1, %v4495_v3  ;;  %v4391_v22 = vpop.permute.xlu1 %4390 }
0x1b6b   :  { %v4393_v23 = vunpack.i.h.bf16 %v4391_v22  ;;  %v4392_v24 = vunpack.i.l.bf16 %v4391_v22 }
0x1b6c   :  { %4311 = vmatmul.mubr.msk.f32.vlgmr.msra.gmra.mrb[36].mxu0 %vm421_vm3, %v3324_v4  ;;  %v4000_v4 = vld [vmem:[#allocation5 + $0x1] ss:$0 sm:$0xff] }
0x1b6d   :  { %v4501_v12 = vpop.eup %4500  ;;  %4322 = vmatprep.mubr.msk.bf16.mxu0 %vm4688_vm2, %v4687_v36  ;;  %4319 = vmatpush3.bf16.msra.mxu0 %v4422_v15  ;;  %v3504_v25 = vsel %vm421_vm3, %v5252_v38, %v4393_v23  ;;  %v3503_v26 = vsel %vm421_vm3, %v5250_v63, %v4392_v24  ;;  %v3994_v63 = vld [vmem:[%s5430_s6 + $0x1] ss:$0 sm:$0xff] }
0x1b6e   :  { %v3326_v14 = vmul.f32 %v4501_v12, %v4497_v6  ;;  %4320 = vmatprep.subr.bf16.mxu0 %v4687_v36  ;;  %v3505_v32 = vsel %vm1765_vm4, %v3503_v26, %v4397_v28  ;;  %v3506_v33 = vsel %vm1765_vm4, %v3504_v25, %v4398_v27  ;;  %v4013_v28 = vld [vmem:[#allocation10 + $0x1] ss:$0 sm:$0xff] }
0x1b70   :  { %4316 = vmatmul.mubr.msk.f32.vlgmr.msra.gmra.mrb[48].mxu1 %vm421_vm3, %v3326_v14 }
0x1b71   :  { %4330 = vmatprep.mubr.msk.bf16.mxu1 %vm4688_vm2, %v4687_v36  ;;  %4321 = vmatpush3.bf16.msra.mxu0 %v4423_v16 }
0x1b72   :  { %4334 = vmatprep.subr.bf16.mxu0 %v4687_v36 }
0x1c3f   :  { %v3399_v17 = vpop.f32.mrb[36].mxu0 }
0x1c40   :  { %v4312_v18 = vpop.f32.mrb[37].mxu0 }
0x1c41   :  { %v4429_v18 = vld [vmem:[%s5435_s11 + $0x38] sm:$0xff]  }
0x1c43   :  { %v3475_v19 = vpop.f32.mrb[48].mxu1 }
0x1c44   :  { %v4399_v20 = vpack.i.bf16 %v3475_v19, %v3399_v17  ;;  %v4317_v21 = vpop.f32.mrb[49].mxu1  ;;  %v4428_v17 = vld [vmem:[%s5435_s11 + $0x30] sm:$0xff]  }
0x1c45   :  { %v4001_v19 = vld [vmem:[#allocation8 + $0x1] ss:$0 sm:$0xff] }
0x1c46   :  { %4400 = vrot.lane.b32.xlu1 %v4399_v20, %s4699_s19 }
0x1cb8   :  { %v4401_v29 = vpop.permute.xlu1 %4400 }
0x1cb9   :  { %v4403_v31 = vunpack.i.h.bf16 %v4401_v29  ;;  %v4402_v30 = vunpack.i.l.bf16 %v4401_v29 }
0x1cbb   :  { %v3508_v34 = vsel %vm1768_vm5, %v3506_v33, %v4403_v31  ;;  %v3507_v35 = vsel %vm1768_vm5, %v3505_v32, %v4402_v30 }
0x1cbc   :  { %v3509_v37 = vpack.c.bf16 %v3508_v34, %v3507_v35 }
0x1cbe   :  { %4323 = vmatmul.mubr.msk.bf16.vlgmr.msra.gmra.mrb[40].mxu0 %vm182_vm0, %v3509_v37 }
0x1cbf   :  { %4342 = vmatprep.mubr.msk.bf16.mxu0 %vm4688_vm2, %v4687_v36  ;;  %4335 = vmatpush3.bf16.msra.mxu0 %v4426_v57 }
0x1cc0   :  { %4336 = vmatprep.subr.bf16.mxu0 %v4687_v36 }
0x1cc3   :  { %4337 = vmatpush3.bf16.msra.mxu0 %v4427_v60 }
0x1cc4   :  { %4338 = vmatprep.subr.bf16.mxu0 %v4687_v36 }
0x1cc7   :  { %4339 = vmatpush3.bf16.msra.mxu0 %v4428_v17 }
0x1cc8   :  { %4340 = vmatprep.subr.bf16.mxu0 %v4687_v36 }
0x1ccb   :  { %4341 = vmatpush3.bf16.msra.mxu0 %v4429_v18 }
0x1d91   :  { %v3572_v38 = vpop.f32.mrb[40].mxu0 }
0x1d92   :  { %v3573_v39 = vadd.f32 %v3994_v63, %v3572_v38  ;;  %v4324_v40 = vpop.f32.mrb[41].mxu0 }
0x1d93   :  { %v3575_v41 = vpop.f32.mrb[42].mxu0 }
0x1d94   :  { %v3579_v42 = vadd.f32 %v3573_v39, %v5178_v58  ;;  %v3576_v7 = vadd.f32 %v3994_v63, %v3575_v41  ;;  %v4325_v8 = vpop.f32.mrb[43].mxu0 }
0x1d96   :  { %v3580_v43 = vadd.f32 %v3576_v7, %v5180_v56  ;;  %v3581_v44 = vsel %vm182_vm0, %v3579_v42, 0.0  ;;  %v4424_v56 = vld [vmem:[#allocation7 + $0x10] sm:$0xff]  }
0x1d97   :  { %3582 = vadd.xlane.f32.xlu0 %v3581_v44  ;;  %4327 = vmatpush3.bf16.msra.mxu1 %v4424_v56  ;;  %v4020_v56 = vld [vmem:[#allocation13 + $0x1] ss:$0 sm:$0xff] }
0x1d98   :  { %v3584_v45 = vsel %vm182_vm0, %v3580_v43, 0.0  ;;  %4328 = vmatprep.subr.bf16.mxu1 %v4687_v36 }
0x1d99   :  { %3585 = vadd.xlane.f32.xlu1 %v3584_v45 }
0x1d9b   :  { %4329 = vmatpush3.bf16.msra.mxu1 %v4425_v55 }
0x1e24   :  { %v3583_v46 = vpop.xlane.xlu0 %3582 }
0x1e25   :  { %v3587_v47 = vmul.f32 0.03125, %v3583_v46 }
0x1e26   :  { %v3586_v48 = vpop.xlane.xlu1 %3585 }
0x1e27   :  { %v3589_v51 = vsub.f32 %v3579_v42, %v3587_v47  ;;  %v3588_v49 = vmul.f32 0.03125, %v3586_v48 }
0x1e29   :  { %v3590_v52 = vsub.f32 %v3580_v43, %v3588_v49  ;;  %v3591_v50 = vmul.f32 %v3589_v51, %v3589_v51 }
0x1e2b   :  { %v3593_v53 = vsel %vm182_vm0, %v3591_v50, 0.0  ;;  %v3592_v58 = vmul.f32 %v3590_v52, %v3590_v52 }
0x1e2c   :  { %3594 = vadd.xlane.f32.xlu0 %v3593_v53  ;;  %v4019_v53 = vld [vmem:[#allocation11 + $0x1] ss:$0 sm:$0xff] }
0x1e2d   :  { %v3596_v54 = vsel %vm182_vm0, %v3592_v58, 0.0 }
0x1e30   :  { %3597 = vadd.xlane.f32.xlu0 %v3596_v54 }
0x1eb9   :  { %v3595_v61 = vpop.xlane.xlu0 %3594 }
0x1eba   :  { %v3599_v62 = vmul.f32 0.03125, %v3595_v61 }
0x1ebc   :  { %v3601_v2 = vadd.f32 1e-05, %v3599_v62 }
0x1ebd   :  { %v3598_v3 = vpop.xlane.xlu0 %3597 }
0x1ebe   :  { %4502 = vrsqrt.f32 %v3601_v2  ;;  %v3600_v5 = vmul.f32 0.03125, %v3598_v3 }
0x1ec0   :  { %v3602_v6 = vadd.f32 1e-05, %v3600_v5 }
0x1ec2   :  { %4504 = vrsqrt.f32 %v3602_v6 }
0x1ec8   :  { %v4503_v59 = vpop.eup %4502 }
0x1ec9   :  { %v3605_v9 = vmul.f32 %v4503_v59, %v3589_v51 }
0x1ecb   :  { %v3615_v13 = vmul.f32 %v3999_v10, %v3605_v9 }
0x1ecc   :  { %v4505_v11 = vpop.eup %4504 }
0x1ecd   :  { %v3606_v1 = vmul.f32 %v4505_v11, %v3590_v52  ;;  %v3625_v14 = vadd.f32 %v4000_v4, %v3615_v13 }
0x1ecf   :  { %v3616_v12 = vmul.f32 %v3999_v10, %v3606_v1 }
0x1ed1   :  { %v3626_v15 = vadd.f32 %v4000_v4, %v3616_v12 }
0x1ed3   :  { %v3627_v16 = vpack.c.bf16 %v3626_v15, %v3625_v14 }
0x1ed5   :  { %4331 = vmatmul.mubr.msk.bf16.vlgmr.msra.gmra.mrb[52].mxu1 %vm182_vm0, %v3627_v16 }
0x1fa8   :  { %v3690_v20 = vpop.f32.mrb[52].mxu1 }
0x1fa9   :  { %v3691_v21 = vadd.f32 %v4001_v19, %v3690_v20  ;;  %v4332_v22 = vpop.f32.mrb[53].mxu1 }
0x1faa   :  { %v3693_v23 = vpop.f32.mrb[54].mxu1 }
0x1fab   :  { %v3694_v24 = vadd.f32 %v4001_v19, %v3693_v23  ;;  %v4333_v0 = vpop.f32.mrb[55].mxu1  ;;  %v3697_v25 = vmax.f32 %v3691_v21, 0.0 }
0x1fad   :  { %v3698_v26 = vmax.f32 %v3694_v24, 0.0 }
0x1faf   :  { %v3699_v27 = vpack.c.bf16 %v3698_v26, %v3697_v25 }
0x1fb1   :  { %4343 = vmatmul.mubr.msk.bf16.vlgmr.msra.gmra.mrb[44].mxu0 %vm1996_vm6, %v3699_v27 }
0x2084   :  { %v3778_v29 = vpop.f32.mrb[44].mxu0 }
0x2085   :  { %v3779_v36 = vadd.f32 %v4013_v28, %v3778_v29  ;;  %v4344_v31 = vpop.f32.mrb[45].mxu0 }
0x2086   :  { %v3781_v30 = vpop.f32.mrb[46].mxu0 }
0x2087   :  { %v3785_v32 = vadd.f32 %v3779_v36, %v3625_v14  ;;  %v3782_v33 = vadd.f32 %v4013_v28, %v3781_v30  ;;  %v4345_v34 = vpop.f32.mrb[47].mxu0 }
0x2089   :  { %v3786_v35 = vadd.f32 %v3782_v33, %v3626_v15  ;;  %v3787_v37 = vsel %vm182_vm0, %v3785_v32, 0.0 }
0x208a   :  { %3788 = vadd.xlane.f32.xlu1 %v3787_v37 }
0x208b   :  { %v3790_v63 = vsel %vm182_vm0, %v3786_v35, 0.0 }
0x208c   :  { %3791 = vadd.xlane.f32.xlu0 %v3790_v63 }
0x2117   :  { %v3789_v38 = vpop.xlane.xlu1 %3788 }
0x2118   :  { %v3793_v39 = vmul.f32 0.03125, %v3789_v38 }
0x2119   :  { %v3792_v40 = vpop.xlane.xlu0 %3791 }
0x211a   :  { %v3795_v41 = vsub.f32 %v3785_v32, %v3793_v39  ;;  %v3794_v42 = vmul.f32 0.03125, %v3792_v40 }
0x211c   :  { %v3796_v7 = vsub.f32 %v3786_v35, %v3794_v42  ;;  %v3797_v8 = vmul.f32 %v3795_v41, %v3795_v41 }
0x211e   :  { %v3799_v43 = vsel %vm182_vm0, %v3797_v8, 0.0  ;;  %v3798_v44 = vmul.f32 %v3796_v7, %v3796_v7 }
0x211f   :  { %3800 = vadd.xlane.f32.xlu1 %v3799_v43 }
0x2120   :  { %v3802_v45 = vsel %vm182_vm0, %v3798_v44, 0.0 }
0x2121   :  { %3803 = vadd.xlane.f32.xlu0 %v3802_v45 }
0x21ac   :  { %v3801_v46 = vpop.xlane.xlu1 %3800 }
0x21ad   :  { %v3805_v47 = vmul.f32 0.03125, %v3801_v46 }
0x21ae   :  { %v3804_v48 = vpop.xlane.xlu0 %3803 }
0x21af   :  { %v3807_v51 = vadd.f32 1e-05, %v3805_v47  ;;  %v3806_v49 = vmul.f32 0.03125, %v3804_v48 }
0x21b1   :  { %4506 = vrsqrt.f32 %v3807_v51  ;;  %v3808_v52 = vadd.f32 1e-05, %v3806_v49 }
0x21b3   :  { %4508 = vrsqrt.f32 %v3808_v52 }
0x21bb   :  { %v4507_v50 = vpop.eup %4506 }
0x21bc   :  { %v3811_v58 = vmul.f32 %v4507_v50, %v3795_v41 }
0x21bd   :  { %v4509_v54 = vpop.eup %4508 }
0x21be   :  { %v3821_v55 = vmul.f32 %v4019_v53, %v3811_v58  ;;  %v3812_v57 = vmul.f32 %v4509_v54, %v3796_v7 }
0x21c0   :  { %v3831_v60 = vadd.f32 %v4020_v56, %v3821_v55  ;;  %v3822_v61 = vmul.f32 %v4019_v53, %v3812_v57 }
0x21c2   :  { %v3832_v62 = vadd.f32 %v4020_v56, %v3822_v61  ;;  %v3839_v2 = vrot.slane %v3831_v60, 1  ;;  %v3860_v5 = vrot.slane %v3831_v60, 5  ;;  %v3856_v10 = vrot.slane %v3831_v60, 4 }
0x21c3   :  { %v3844_v1 = vrot.slane %v3831_v60, 2  ;;  %v3850_v16 = vrot.slane %v3831_v60, 3  ;;  %v3866_v19 = vrot.slane %v3831_v60, 6  ;;  %v3872_v22 = vrot.slane %v3831_v60, 7 }
0x21c4   :  { %v3840_v3 = vsel %vm3836_vm7, %v3832_v62, %v3839_v2  ;;  %v3861_v6 = vrot.slane %v3832_v62, 4  ;;  %v3845_v59 = vrot.slane %v3832_v62, 1  ;;  %v3835_v9 = vrot.slane %v3832_v62, 7 }
0x21c5   :  { %3841 = vrot.lane.b32.xlu1 %v3840_v3, %s4686_s2  ;;  %v3857_v11 = vrot.slane %v3832_v62, 3  ;;  %v3851_v4 = vrot.slane %v3832_v62, 2  ;;  %v3867_v17 = vrot.slane %v3832_v62, 5  ;;  %v3873_v21 = vrot.slane %v3832_v62, 6 }
0x21c6   :  { %v3862_v13 = vsel %vm3836_vm7, %v3861_v6, %v3860_v5  ;;  %v3837_v12 = vsel %vm3836_vm7, %v3835_v9, %v3831_v60  ;;  %v3846_v15 = vsel %vm3836_vm7, %v3845_v59, %v3844_v1 }
0x21c7   :  { %3863 = vrot.lane.b32.xlu0 %v3862_v13, %s4686_s2  ;;  %v3858_v14 = vsel %vm3836_vm7, %v3857_v11, %v3856_v10  ;;  %v3852_v18 = vsel %vm3836_vm7, %v3851_v4, %v3850_v16  ;;  %v3868_v20 = vsel %vm3836_vm7, %v3867_v17, %v3866_v19  ;;  %v3874_v23 = vsel %vm3836_vm7, %v3873_v21, %v3872_v22 }
0x21c9   :  { %3847 = vrot.lane.b32.xlu1 %v3846_v15, %s4679_s0 }
0x21cb   :  { %3853 = vrot.lane.b32.xlu0 %v3852_v18, %s4685_s1 }
0x21cd   :  { %3869 = vrot.lane.b32.xlu1 %v3868_v20, %s4679_s0  ;;  %s5441_s0 = sld [smem:[#allocation18_spill]] }
0x21d1   :  { %3875 = vrot.lane.b32.xlu1 %v3874_v23, %s4685_s1 }
0x2237   :  { %v3842_v24 = vpop.permute.xlu1 %3841 }
0x2238   :  { %v3878_v27 = vsel %vm182_vm0, %v3837_v12, %v3842_v24 }
0x2239   :  { %v3864_v0 = vpop.permute.xlu0 %3863 }
0x223a   :  { %v3882_v36 = vsel %vm182_vm0, %v3858_v14, %v3864_v0 }
0x223b   :  { %v3848_v25 = vpop.permute.xlu1 %3847 }
0x223c   :  { %v3879_v28 = vsel %vm1996_vm6, %v3878_v27, %v3848_v25 }
0x223d   :  { %v3854_v29 = vpop.permute.xlu0 %3853 }
0x223e   :  { %v3881_v32 = vsel %vm3880_vm8, %v3879_v28, %v3854_v29 }
0x223f   :  { %v3870_v26 = vpop.permute.xlu1 %3869 }
0x2240   :  { %v3883_v31 = vsel %vm1996_vm6, %v3882_v36, %v3870_v26 }
0x2243   :  { %v3876_v30 = vpop.permute.xlu1 %3875 }
0x2244   :  { %v3884_v33 = vsel %vm3880_vm8, %v3883_v31, %v3876_v30 }
0x2245   :  { %v3887_v34 = vcombine.low %v3881_v32, %v3884_v33 }
0x2247   :  { %4021 = vst.sshfl [vmem:[%s5441_s0] sm:$0x33 pattern:$0x76325410] %v3887_v34 }
0x2248   :  { %3901 = vsyncpa [#allocation4], 1 }
0x2249   :  { %3902 = vsyncpa [#allocation6], 1 }
0x224a   :  { %3903 = vsyncpa [#allocation9], 1 }
0x224b   :  { %3904 = vsyncpa [#allocation12], 1 }

</bundles_post_ra>
